<compile_context>
chip_gen: v5e
topology: v5e:2x2
jax: 0.10.0
libtpu: 0.0.40
codegen_flags: <defaults>
</compile_context>

<pallas_src>
import math

import jax
import jax.numpy as jnp
from jax.experimental import pallas as pl
from jax.experimental.pallas import tpu as pltpu


def mgnn3_kernel(a1_ref, a2_ref, a3_ref,
                 xw1_ref, xw2_ref, xw3_ref,
                 b1_ref, b2_ref, b3_ref,
                 wl_ref, bl_ref,
                 o_ref,
                 acc1, acc2, acc3):
    k = pl.program_id(1)

    @pl.when(k == 0)
    def _init():
        acc1[...] = jnp.zeros_like(acc1)
        acc2[...] = jnp.zeros_like(acc2)
        acc3[...] = jnp.zeros_like(acc3)

    # Reduction step: accumulate A_hat_g[i, k] @ (X W_g)[k] in f32 (bf16 MXU inputs).
    acc1[...] += jnp.dot(a1_ref[...], xw1_ref[...], preferred_element_type=jnp.float32)
    acc2[...] += jnp.dot(a2_ref[...], xw2_ref[...], preferred_element_type=jnp.float32)
    acc3[...] += jnp.dot(a3_ref[...], xw3_ref[...], preferred_element_type=jnp.float32)

    @pl.when(k == pl.num_programs(1) - 1)
    def _finalize():
        # Per-branch bias + ReLU (dropout is identity in eval mode).
        h1 = jnp.maximum(acc1[...] + b1_ref[...], 0.0)
        h2 = jnp.maximum(acc2[...] + b2_ref[...], 0.0)
        h3 = jnp.maximum(acc3[...] + b3_ref[...], 0.0)
        # Branch sum + outer ReLU (idempotent on a sum of ReLUs, kept for fidelity).
        h = jnp.maximum(h1 + h2 + h3, 0.0)
        # Linear head (padded class columns carry a -1e30 bias).
        z = jnp.dot(h, wl_ref[...], preferred_element_type=jnp.float32) + bl_ref[...]
        # log_softmax over classes (max-stabilized; padded columns -> exp ~ 0).
        m = jnp.max(z, axis=-1, keepdims=True)
        s = z - m
        lse = jnp.log(jnp.sum(jnp.exp(s), axis=-1, keepdims=True))
        o_ref[...] = s - lse


def _round_up(x, m):
    return (x + m - 1) // m * m


def mgnn3_forward(a_list, x, conv_params, lin_w, lin_b,
                  *, tm=1024, tk=512, vmem_limit_bytes=None):
    """Fused MGNN3 forward.

    a_list      : 3 dense gcn-normalized adjacencies [N, N] f32 (row=target, col=source)
    x           : [N, F_in] node features
    conv_params : 3 tuples (W_g [F_in, H], b_g [H]) for the GCNConv branches
    lin_w, lin_b: Linear head [H, C], [C]
    tm, tk      : row tile / reduction (source-node) tile; multiples of 128.
                  Defaults (1024, 512) fit the v5e 16 MiB default scoped-VMEM limit;
                  on v6e/v7x tk can be raised to 1024+ with vmem_limit_bytes.
    """
    assert tm % 128 == 0 and tk % 128 == 0, "tile sizes must be lane/sublane aligned"
    N, _ = x.shape
    H = conv_params[0][0].shape[1]
    C = lin_w.shape[1]

    LANE = 128
    n_pad = _round_up(N, math.lcm(tm, tk))
    h_pad = _round_up(H, LANE)
    c_pad = _round_up(C, LANE)

    # Precompute XW_g with XLA (tiny matmul), pad lane dims, cast to bf16.
    xw_list, b_list = [], []
    for w_g, b_g in conv_params:
        xw = (x @ w_g).astype(jnp.float32)
        xw_p = jnp.zeros((n_pad, h_pad), jnp.float32).at[:N, :H].set(xw)
        xw_list.append(xw_p.astype(jnp.bfloat16))
        b_list.append(jnp.zeros((1, h_pad), jnp.float32).at[0, :H].set(b_g))

    a_pad_list = [
        jnp.zeros((n_pad, n_pad), jnp.bfloat16).at[:N, :N].set(a.astype(jnp.bfloat16))
        for a in a_list
    ]

    wl_p = jnp.zeros((h_pad, c_pad), jnp.float32).at[:H, :C].set(lin_w)
    # Padded class columns get a huge negative bias so they vanish in log_softmax.
    bl_p = jnp.full((1, c_pad), -1e30, jnp.float32).at[0, :C].set(lin_b)

    grid = (n_pad // tm, n_pad // tk)

    a_spec = pl.BlockSpec((tm, tk), lambda i, k: (i, k))
    xw_spec = pl.BlockSpec((tk, h_pad), lambda i, k: (k, 0))
    const2 = lambda i, k: (0, 0)
    b_spec = pl.BlockSpec((1, h_pad), const2)
    wl_spec = pl.BlockSpec((h_pad, c_pad), const2)
    bl_spec = pl.BlockSpec((1, c_pad), const2)
    out_spec = pl.BlockSpec((tm, c_pad), lambda i, k: (i, 0))

    # Advisory cost model: mem-bound on the 3x N^2 bf16 adjacency stream.
    flops = 2 * 3 * n_pad * n_pad * h_pad + 2 * n_pad * h_pad * c_pad
    bytes_accessed = (3 * n_pad * n_pad * 2                       # A_hat tiles (bf16)
                      + 3 * (n_pad // tm) * n_pad * h_pad * 2     # XW re-stream per row tile
                      + n_pad * c_pad * 4)                        # output (f32)
    cost = pl.CostEstimate(flops=flops,
                           transcendentals=n_pad * c_pad,
                           bytes_accessed=bytes_accessed)

    out_p = pl.pallas_call(
        mgnn3_kernel,
        out_shape=jax.ShapeDtypeStruct((n_pad, c_pad), jnp.float32),
        grid_spec=pltpu.PrefetchScalarGridSpec(
            num_scalar_prefetch=0,
            grid=grid,
            in_specs=[a_spec, a_spec, a_spec,
                      xw_spec, xw_spec, xw_spec,
                      b_spec, b_spec, b_spec,
                      wl_spec, bl_spec],
            out_specs=out_spec,
            scratch_shapes=[pltpu.VMEM((tm, h_pad), jnp.float32)] * 3,
        ),
        compiler_params=pltpu.CompilerParams(
            dimension_semantics=("parallel", "arbitrary"),
            vmem_limit_bytes=vmem_limit_bytes,
        ),
        cost_estimate=cost,
    )(*a_pad_list, *xw_list, *b_list, wl_p, bl_p)

    return out_p[:N, :C]


def build_normalized_adjacency(edge_index, edge_weight, num_nodes):
    """PyG gcn_norm: add self-loops (weight 1), deg = scatter_add over targets,
    norm = d^{-1/2}[src] * w * d^{-1/2}[dst]; dense A_hat[dst, src] = norm."""
    row, col = edge_index[0], edge_index[1]            # src, dst
    loop = jnp.arange(num_nodes, dtype=edge_index.dtype)
    row = jnp.concatenate([row, loop])
    col = jnp.concatenate([col, loop])
    w = jnp.concatenate([edge_weight, jnp.ones((num_nodes,), edge_weight.dtype)])
    deg = jnp.zeros((num_nodes,), jnp.float32).at[col].add(w)
    dinv = jnp.where(deg > 0, 1.0 / jnp.sqrt(deg), 0.0)
    norm = dinv[row] * w * dinv[col]
    a_hat = jnp.zeros((num_nodes, num_nodes), jnp.float32).at[col, row].add(norm)
    return a_hat


def reference_forward(a_list, x, conv_params, lin_w, lin_b, quantize_bf16=False):
    hs = []
    for a, (w_g, b_g) in zip(a_list, conv_params):
        xw = x @ w_g
        if quantize_bf16:
            a = a.astype(jnp.bfloat16).astype(jnp.float32)
            xw = xw.astype(jnp.bfloat16).astype(jnp.float32)
        hs.append(jnp.maximum(a @ xw + b_g, 0.0))
    h = jnp.maximum(hs[0] + hs[1] + hs[2], 0.0)
    z = h @ lin_w + lin_b
    return jax.nn.log_softmax(z, axis=1)


if __name__ == "__main__":
    key = jax.random.PRNGKey(0)
    # nodes, in_channels, hidden_channels, num_classes, edges-per-graph
    N, F_in, H, C, E = 200, 16, 32, 8, 600
    keys = jax.random.split(key, 20)

    x = jax.random.normal(keys[0], (N, F_in), jnp.float32)

    a_list = []
    for g in range(3):
        src = jax.random.randint(keys[1 + 3 * g], (E,), 0, N).astype(jnp.int32)
        dst = jax.random.randint(keys[2 + 3 * g], (E,), 0, N).astype(jnp.int32)
        ew = jax.random.uniform(keys[3 + 3 * g], (E,), jnp.float32, 0.1, 1.0)
        edge_index = jnp.stack([src, dst])
        a_list.append(build_normalized_adjacency(edge_index, ew, N))

    conv_params = []
    for g in range(3):
        w_g = jax.random.normal(keys[10 + 2 * g], (F_in, H), jnp.float32) / jnp.sqrt(F_in)
        b_g = jax.random.normal(keys[11 + 2 * g], (H,), jnp.float32) * 0.01
        conv_params.append((w_g, b_g))
    lin_w = jax.random.normal(keys[16], (H, C), jnp.float32) / jnp.sqrt(H)
    lin_b = jax.random.normal(keys[17], (C,), jnp.float32) * 0.01

    # Small tiles for the small test graph (N=200 -> padded to 256, grid=(2, 2)).
    out = mgnn3_forward(a_list, x, conv_params, lin_w, lin_b, tm=128, tk=128)
    out = jax.block_until_ready(out)

    ref_q = reference_forward(a_list, x, conv_params, lin_w, lin_b, quantize_bf16=True)
    ref_f = reference_forward(a_list, x, conv_params, lin_w, lin_b, quantize_bf16=False)

    assert out.shape == (N, C)
    # Tight check vs. a reference using the same bf16-quantized aggregation inputs.
    assert jnp.allclose(out, ref_q, atol=1e-3, rtol=1e-3), float(jnp.max(jnp.abs(out - ref_q)))
    # Loose check vs. the pure-f32 semantics (absorbs the bf16 cast of a_hat / XW).
    assert jnp.allclose(out, ref_f, atol=5e-2, rtol=5e-2), float(jnp.max(jnp.abs(out - ref_f)))

    print("KERNEL_OK")
</pallas_src>

<mosaic_0001>
module attributes {stable_mosaic.version = 11 : i64} {
  func.func @mgnn3_kernel(%arg0: i32, %arg1: i32, %arg2: memref<128x128xbf16, #tpu.memory_space<vmem>>, %arg3: memref<128x128xbf16, #tpu.memory_space<vmem>>, %arg4: memref<128x128xbf16, #tpu.memory_space<vmem>>, %arg5: memref<128x128xbf16, #tpu.memory_space<vmem>>, %arg6: memref<128x128xbf16, #tpu.memory_space<vmem>>, %arg7: memref<128x128xbf16, #tpu.memory_space<vmem>>, %arg8: memref<1x128xf32, #tpu.memory_space<vmem>>, %arg9: memref<1x128xf32, #tpu.memory_space<vmem>>, %arg10: memref<1x128xf32, #tpu.memory_space<vmem>>, %arg11: memref<128x128xf32, #tpu.memory_space<vmem>>, %arg12: memref<1x128xf32, #tpu.memory_space<vmem>>, %arg13: memref<128x128xf32, #tpu.memory_space<vmem>>, %arg14: memref<128x128xf32, #tpu.memory_space<vmem>>, %arg15: memref<128x128xf32, #tpu.memory_space<vmem>>, %arg16: memref<128x128xf32, #tpu.memory_space<vmem>>) attributes {dimension_semantics = [#tpu.dimension_semantics<parallel>, #tpu.dimension_semantics<arbitrary>], iteration_bounds = array<i64: 2, 2>, scalar_prefetch = 0 : i64, scratch_operands = 3 : i64, tpu.core_type = #tpu.core_type<tc>, window_params = [{transform_indices = @transform_0, window_bounds = array<i64: 128, 128>}, {transform_indices = @transform_1, window_bounds = array<i64: 128, 128>}, {transform_indices = @transform_2, window_bounds = array<i64: 128, 128>}, {transform_indices = @transform_3, window_bounds = array<i64: 128, 128>}, {transform_indices = @transform_4, window_bounds = array<i64: 128, 128>}, {transform_indices = @transform_5, window_bounds = array<i64: 128, 128>}, {pipeline_mode = #tpu.pipeline_mode<synchronous>, transform_indices = @transform_6, window_bounds = array<i64: 1, 128>}, {pipeline_mode = #tpu.pipeline_mode<synchronous>, transform_indices = @transform_7, window_bounds = array<i64: 1, 128>}, {pipeline_mode = #tpu.pipeline_mode<synchronous>, transform_indices = @transform_8, window_bounds = array<i64: 1, 128>}, {pipeline_mode = #tpu.pipeline_mode<synchronous>, transform_indices = @transform_9, window_bounds = array<i64: 128, 128>}, {pipeline_mode = #tpu.pipeline_mode<synchronous>, transform_indices = @transform_10, window_bounds = array<i64: 1, 128>}, {transform_indices = @transform_11, window_bounds = array<i64: 128, 128>}]} {
    %c0_i32 = arith.constant 0 : i32
    %0 = arith.cmpi eq, %arg1, %c0_i32 : i32
    %1 = arith.extui %0 : i1 to i32
    %c0_i32_0 = arith.constant 0 : i32
    %2 = arith.cmpi ne, %1, %c0_i32_0 : i32
    scf.if %2 {
      %cst_27 = arith.constant 0.000000e+00 : f32
      %24 = vector.broadcast %cst_27 : f32 to vector<128x128xf32>
      %c0_28 = arith.constant 0 : index
      %c0_29 = arith.constant 0 : index
      %25 = vector.load %arg14[%c0_28, %c0_29] : memref<128x128xf32, #tpu.memory_space<vmem>>, vector<128x128xf32>
      tpu.vector_store %arg14[%c0_28, %c0_29], %24 {strides = array<i32>} : memref<128x128xf32, #tpu.memory_space<vmem>>, vector<128x128xf32>,
      %cst_30 = arith.constant 0.000000e+00 : f32
      %26 = vector.broadcast %cst_30 : f32 to vector<128x128xf32>
      %c0_31 = arith.constant 0 : index
      %c0_32 = arith.constant 0 : index
      %27 = vector.load %arg15[%c0_31, %c0_32] : memref<128x128xf32, #tpu.memory_space<vmem>>, vector<128x128xf32>
      tpu.vector_store %arg15[%c0_31, %c0_32], %26 {strides = array<i32>} : memref<128x128xf32, #tpu.memory_space<vmem>>, vector<128x128xf32>,
      %cst_33 = arith.constant 0.000000e+00 : f32
      %28 = vector.broadcast %cst_33 : f32 to vector<128x128xf32>
      %c0_34 = arith.constant 0 : index
      %c0_35 = arith.constant 0 : index
      %29 = vector.load %arg16[%c0_34, %c0_35] : memref<128x128xf32, #tpu.memory_space<vmem>>, vector<128x128xf32>
      tpu.vector_store %arg16[%c0_34, %c0_35], %28 {strides = array<i32>} : memref<128x128xf32, #tpu.memory_space<vmem>>, vector<128x128xf32>,
    } else {
    }
    %c0 = arith.constant 0 : index
    %c0_1 = arith.constant 0 : index
    %3 = vector.load %arg14[%c0, %c0_1] : memref<128x128xf32, #tpu.memory_space<vmem>>, vector<128x128xf32>
    %c0_2 = arith.constant 0 : index
    %c0_3 = arith.constant 0 : index
    %4 = vector.load %arg2[%c0_2, %c0_3] : memref<128x128xbf16, #tpu.memory_space<vmem>>, vector<128x128xbf16>
    %c0_4 = arith.constant 0 : index
    %c0_5 = arith.constant 0 : index
    %5 = vector.load %arg5[%c0_4, %c0_5] : memref<128x128xbf16, #tpu.memory_space<vmem>>, vector<128x128xbf16>
    %cst = arith.constant dense<0.000000e+00> : vector<128x128xf32>
    %6 = tpu.matmul %4, %5, %cst {dimension_numbers = #tpu.dot_dimension_numbers<[1], [0], [0], [1], [0, 0, 1, 1], [], []>} : vector<128x128xbf16>, vector<128x128xbf16>, vector<128x128xf32> -> vector<128x128xf32>
    %7 = arith.addf %3, %6 : vector<128x128xf32>
    %c0_6 = arith.constant 0 : index
    %c0_7 = arith.constant 0 : index
    %8 = vector.load %arg14[%c0_6, %c0_7] : memref<128x128xf32, #tpu.memory_space<vmem>>, vector<128x128xf32>
    tpu.vector_store %arg14[%c0_6, %c0_7], %7 {strides = array<i32>} : memref<128x128xf32, #tpu.memory_space<vmem>>, vector<128x128xf32>,
    %c0_8 = arith.constant 0 : index
    %c0_9 = arith.constant 0 : index
    %9 = vector.load %arg15[%c0_8, %c0_9] : memref<128x128xf32, #tpu.memory_space<vmem>>, vector<128x128xf32>
    %c0_10 = arith.constant 0 : index
    %c0_11 = arith.constant 0 : index
    %10 = vector.load %arg3[%c0_10, %c0_11] : memref<128x128xbf16, #tpu.memory_space<vmem>>, vector<128x128xbf16>
    %c0_12 = arith.constant 0 : index
    %c0_13 = arith.constant 0 : index
    %11 = vector.load %arg6[%c0_12, %c0_13] : memref<128x128xbf16, #tpu.memory_space<vmem>>, vector<128x128xbf16>
    %cst_14 = arith.constant dense<0.000000e+00> : vector<128x128xf32>
    %12 = tpu.matmul %10, %11, %cst_14 {dimension_numbers = #tpu.dot_dimension_numbers<[1], [0], [0], [1], [0, 0, 1, 1], [], []>} : vector<128x128xbf16>, vector<128x128xbf16>, vector<128x128xf32> -> vector<128x128xf32>
    %13 = arith.addf %9, %12 : vector<128x128xf32>
    %c0_15 = arith.constant 0 : index
    %c0_16 = arith.constant 0 : index
    %14 = vector.load %arg15[%c0_15, %c0_16] : memref<128x128xf32, #tpu.memory_space<vmem>>, vector<128x128xf32>
    tpu.vector_store %arg15[%c0_15, %c0_16], %13 {strides = array<i32>} : memref<128x128xf32, #tpu.memory_space<vmem>>, vector<128x128xf32>,
    %c0_17 = arith.constant 0 : index
    %c0_18 = arith.constant 0 : index
    %15 = vector.load %arg16[%c0_17, %c0_18] : memref<128x128xf32, #tpu.memory_space<vmem>>, vector<128x128xf32>
    %c0_19 = arith.constant 0 : index
    %c0_20 = arith.constant 0 : index
    %16 = vector.load %arg4[%c0_19, %c0_20] : memref<128x128xbf16, #tpu.memory_space<vmem>>, vector<128x128xbf16>
    %c0_21 = arith.constant 0 : index
    %c0_22 = arith.constant 0 : index
    %17 = vector.load %arg7[%c0_21, %c0_22] : memref<128x128xbf16, #tpu.memory_space<vmem>>, vector<128x128xbf16>
    %cst_23 = arith.constant dense<0.000000e+00> : vector<128x128xf32>
    %18 = tpu.matmul %16, %17, %cst_23 {dimension_numbers = #tpu.dot_dimension_numbers<[1], [0], [0], [1], [0, 0, 1, 1], [], []>} : vector<128x128xbf16>, vector<128x128xbf16>, vector<128x128xf32> -> vector<128x128xf32>
    %19 = arith.addf %15, %18 : vector<128x128xf32>
    %c0_24 = arith.constant 0 : index
    %c0_25 = arith.constant 0 : index
    %20 = vector.load %arg16[%c0_24, %c0_25] : memref<128x128xf32, #tpu.memory_space<vmem>>, vector<128x128xf32>
    tpu.vector_store %arg16[%c0_24, %c0_25], %19 {strides = array<i32>} : memref<128x128xf32, #tpu.memory_space<vmem>>, vector<128x128xf32>,
    %c1_i32 = arith.constant 1 : i32
    %21 = arith.cmpi eq, %arg1, %c1_i32 : i32
    %22 = arith.extui %21 : i1 to i32
    %c0_i32_26 = arith.constant 0 : i32
    %23 = arith.cmpi ne, %22, %c0_i32_26 : i32
    scf.if %23 {
      %c0_27 = arith.constant 0 : index
      %c0_28 = arith.constant 0 : index
      %24 = vector.load %arg14[%c0_27, %c0_28] : memref<128x128xf32, #tpu.memory_space<vmem>>, vector<128x128xf32>
      %c0_29 = arith.constant 0 : index
      %c0_30 = arith.constant 0 : index
      %25 = vector.load %arg8[%c0_29, %c0_30] : memref<1x128xf32, #tpu.memory_space<vmem>>, vector<1x128xf32>
      %26 = vector.broadcast %25 : vector<1x128xf32> to vector<128x128xf32>
      %27 = arith.addf %24, %26 : vector<128x128xf32>
      %cst_31 = arith.constant 0.000000e+00 : f32
      %28 = vector.broadcast %cst_31 : f32 to vector<128x128xf32>
      %29 = arith.maximumf %27, %28 : vector<128x128xf32>
      %c0_32 = arith.constant 0 : index
      %c0_33 = arith.constant 0 : index
      %30 = vector.load %arg15[%c0_32, %c0_33] : memref<128x128xf32, #tpu.memory_space<vmem>>, vector<128x128xf32>
      %c0_34 = arith.constant 0 : index
      %c0_35 = arith.constant 0 : index
      %31 = vector.load %arg9[%c0_34, %c0_35] : memref<1x128xf32, #tpu.memory_space<vmem>>, vector<1x128xf32>
      %32 = vector.broadcast %31 : vector<1x128xf32> to vector<128x128xf32>
      %33 = arith.addf %30, %32 : vector<128x128xf32>
      %cst_36 = arith.constant 0.000000e+00 : f32
      %34 = vector.broadcast %cst_36 : f32 to vector<128x128xf32>
      %35 = arith.maximumf %33, %34 : vector<128x128xf32>
      %c0_37 = arith.constant 0 : index
      %c0_38 = arith.constant 0 : index
      %36 = vector.load %arg16[%c0_37, %c0_38] : memref<128x128xf32, #tpu.memory_space<vmem>>, vector<128x128xf32>
      %c0_39 = arith.constant 0 : index
      %c0_40 = arith.constant 0 : index
      %37 = vector.load %arg10[%c0_39, %c0_40] : memref<1x128xf32, #tpu.memory_space<vmem>>, vector<1x128xf32>
      %38 = vector.broadcast %37 : vector<1x128xf32> to vector<128x128xf32>
      %39 = arith.addf %36, %38 : vector<128x128xf32>
      %cst_41 = arith.constant 0.000000e+00 : f32
      %40 = vector.broadcast %cst_41 : f32 to vector<128x128xf32>
      %41 = arith.maximumf %39, %40 : vector<128x128xf32>
      %42 = arith.addf %29, %35 : vector<128x128xf32>
      %43 = arith.addf %42, %41 : vector<128x128xf32>
      %cst_42 = arith.constant 0.000000e+00 : f32
      %44 = vector.broadcast %cst_42 : f32 to vector<128x128xf32>
      %45 = arith.maximumf %43, %44 : vector<128x128xf32>
      %c0_43 = arith.constant 0 : index
      %c0_44 = arith.constant 0 : index
      %46 = vector.load %arg11[%c0_43, %c0_44] : memref<128x128xf32, #tpu.memory_space<vmem>>, vector<128x128xf32>
      %cst_45 = arith.constant dense<0.000000e+00> : vector<128x128xf32>
      %47 = tpu.matmul %45, %46, %cst_45 {dimension_numbers = #tpu.dot_dimension_numbers<[1], [0], [0], [1], [0, 0, 1, 1], [], []>} : vector<128x128xf32>, vector<128x128xf32>, vector<128x128xf32> -> vector<128x128xf32>
      %c0_46 = arith.constant 0 : index
      %c0_47 = arith.constant 0 : index
      %48 = vector.load %arg12[%c0_46, %c0_47] : memref<1x128xf32, #tpu.memory_space<vmem>>, vector<1x128xf32>
      %49 = vector.broadcast %48 : vector<1x128xf32> to vector<128x128xf32>
      %50 = arith.addf %47, %49 : vector<128x128xf32>
      %cst_48 = arith.constant dense<0xFF800000> : vector<128xf32>
      %51 = vector.multi_reduction <maximumf>, %50, %cst_48 [1] : vector<128x128xf32> to vector<128xf32>
      %52 = vector.shape_cast %51 : vector<128xf32> to vector<128x1xf32>
      %53 = vector.broadcast %52 : vector<128x1xf32> to vector<128x128xf32>
      %54 = arith.subf %50, %53 : vector<128x128xf32>
      %55 = math.exp %54 : vector<128x128xf32>
      %cst_49 = arith.constant dense<0.000000e+00> : vector<128xf32>
      %56 = vector.multi_reduction <add>, %55, %cst_49 [1] : vector<128x128xf32> to vector<128xf32>
      %57 = vector.shape_cast %56 : vector<128xf32> to vector<128x1xf32>
      %58 = math.log %57 : vector<128x1xf32>
      %59 = vector.broadcast %58 : vector<128x1xf32> to vector<128x128xf32>
      %60 = arith.subf %54, %59 : vector<128x128xf32>
      %c0_50 = arith.constant 0 : index
      %c0_51 = arith.constant 0 : index
      %61 = vector.load %arg13[%c0_50, %c0_51] : memref<128x128xf32, #tpu.memory_space<vmem>>, vector<128x128xf32>
      tpu.vector_store %arg13[%c0_50, %c0_51], %60 {strides = array<i32>} : memref<128x128xf32, #tpu.memory_space<vmem>>, vector<128x128xf32>,
    } else {
    }
    return
  }
  func.func @transform_0(%arg0: i32, %arg1: i32) -> (i32, i32) {
    %c0_i32 = arith.constant 0 : i32
    return %arg0, %arg1 : i32, i32
  }
  func.func @transform_1(%arg0: i32, %arg1: i32) -> (i32, i32) {
    %c0_i32 = arith.constant 0 : i32
    return %arg0, %arg1 : i32, i32
  }
  func.func @transform_2(%arg0: i32, %arg1: i32) -> (i32, i32) {
    %c0_i32 = arith.constant 0 : i32
    return %arg0, %arg1 : i32, i32
  }
  func.func @transform_3(%arg0: i32, %arg1: i32) -> (i32, i32) {
    %c0_i32 = arith.constant 0 : i32
    %c0_i32_0 = arith.constant 0 : i32
    return %arg1, %c0_i32 : i32, i32
  }
  func.func @transform_4(%arg0: i32, %arg1: i32) -> (i32, i32) {
    %c0_i32 = arith.constant 0 : i32
    %c0_i32_0 = arith.constant 0 : i32
    return %arg1, %c0_i32 : i32, i32
  }
  func.func @transform_5(%arg0: i32, %arg1: i32) -> (i32, i32) {
    %c0_i32 = arith.constant 0 : i32
    %c0_i32_0 = arith.constant 0 : i32
    return %arg1, %c0_i32 : i32, i32
  }
  func.func @transform_6(%arg0: i32, %arg1: i32) -> (i32, i32) {
    %c0_i32 = arith.constant 0 : i32
    %c0_i32_0 = arith.constant 0 : i32
    %c0_i32_1 = arith.constant 0 : i32
    return %c0_i32, %c0_i32_0 : i32, i32
  }
  func.func @transform_7(%arg0: i32, %arg1: i32) -> (i32, i32) {
    %c0_i32 = arith.constant 0 : i32
    %c0_i32_0 = arith.constant 0 : i32
    %c0_i32_1 = arith.constant 0 : i32
    return %c0_i32, %c0_i32_0 : i32, i32
  }
  func.func @transform_8(%arg0: i32, %arg1: i32) -> (i32, i32) {
    %c0_i32 = arith.constant 0 : i32
    %c0_i32_0 = arith.constant 0 : i32
    %c0_i32_1 = arith.constant 0 : i32
    return %c0_i32, %c0_i32_0 : i32, i32
  }
  func.func @transform_9(%arg0: i32, %arg1: i32) -> (i32, i32) {
    %c0_i32 = arith.constant 0 : i32
    %c0_i32_0 = arith.constant 0 : i32
    %c0_i32_1 = arith.constant 0 : i32
    return %c0_i32, %c0_i32_0 : i32, i32
  }
  func.func @transform_10(%arg0: i32, %arg1: i32) -> (i32, i32) {
    %c0_i32 = arith.constant 0 : i32
    %c0_i32_0 = arith.constant 0 : i32
    %c0_i32_1 = arith.constant 0 : i32
    return %c0_i32, %c0_i32_0 : i32, i32
  }
  func.func @transform_11(%arg0: i32, %arg1: i32) -> (i32, i32) {
    %c0_i32 = arith.constant 0 : i32
    %c0_i32_0 = arith.constant 0 : i32
    return %arg0, %c0_i32 : i32, i32
  }
}

</mosaic_0001>

<bundles_post_ra>
// kernel: tpu_custom_call.1
= control target key start
LH: loop header
LB: loop body
LE: loop exit
PB: predicated region body
PF: predicated region fallthrough
CT: control target
= control target key end

     0   :  { %s3766_s0 = inlined_call_operand.hbm [shape: bf16[256,256], index: 0, kind: input, shape index: {}]   ;;  %s3767_s1 = inlined_call_operand.hbm [shape: bf16[256,256], index: 1, kind: input, shape index: {}]   ;;  %s3768_s2 = inlined_call_operand.hbm [shape: bf16[256,256], index: 2, kind: input, shape index: {}]   ;;  %s3769_s3 = inlined_call_operand.hbm [shape: bf16[256,128], index: 3, kind: input, shape index: {}]   ;;  %s3770_s4 = inlined_call_operand.hbm [shape: bf16[256,128], index: 4, kind: input, shape index: {}]   ;;  %s3771_s5 = inlined_call_operand.hbm [shape: bf16[256,128], index: 5, kind: input, shape index: {}]   ;;  %s3772_s6 = inlined_call_operand.vmem [shape: f32[1,128], index: 6, kind: input, shape index: {}]   ;;  %s3773_s7 = inlined_call_operand.vmem [shape: f32[1,128], index: 7, kind: input, shape index: {}]   ;;  %s3774_s8 = inlined_call_operand.vmem [shape: f32[1,128], index: 8, kind: input, shape index: {}]   ;;  %s3775_s9 = inlined_call_operand.hbm [shape: f32[128,128], index: 9, kind: input, shape index: {}]   ;;  %s3776_s10 = inlined_call_operand.vmem [shape: f32[1,128], index: 10, kind: input, shape index: {}]   ;;  %s3777_s11 = inlined_call_operand.hbm [shape: f32[256,128], index: 11, kind: output, shape index: {}]  }
   0x1   :  { %3803 = sst [smem:[#allocation41_spill]] %s3766_s0 }
   0x2   :  { %3804 = sst [smem:[#allocation42_spill]] %s3767_s1 }
   0x3   :  { %3805 = sst [smem:[#allocation43_spill]] %s3769_s3 }
   0x4   :  { %3806 = sst [smem:[#allocation44_spill]] %s3772_s6 }
   0x5   :  { %3807 = sst [smem:[#allocation45_spill]] %s3773_s7 }
   0x6   :  { %3808 = sst [smem:[#allocation46_spill]] %s3774_s8 }
   0x7   :  { %3809 = sst [smem:[#allocation47_spill]] %s3775_s9 }
   0x8   :  { %3810 = sst [smem:[#allocation48_spill]] %s3776_s10 }
   0x9   :  { %3811 = sst [smem:[#allocation49_spill]] %s3777_s11 }
   0xa   :  { %16 = vsyncpa [#allocation6], 0 }
   0xb   :  { %18 = vsyncpa [#allocation6 + $0x1], 0 }
   0xc   :  { %19 = vsyncpa [#allocation9], 0 }
   0xd   :  { %21 = vsyncpa [#allocation9 + $0x1], 0 }
   0xe   :  { %22 = vsyncpa [#allocation12], 0 }
   0xf   :  { %24 = vsyncpa [#allocation12 + $0x1], 0 }
  0x10   :  { %25 = vsyncpa [#allocation15], 0 }
  0x11   :  { %27 = vsyncpa [#allocation15 + $0x1], 0 }
  0x12   :  { %28 = vsyncpa [#allocation7], 0 }
  0x13   :  { %30 = vsyncpa [#allocation7 + $0x1], 0  ;;  %s3118_s17 = smov 0   ;;  %s3120_s18 = smov 0  }
  0x14   :  { %s3122_s19 = smov 0   ;;  %s3124_s20 = smov 0  }
  0x15   :  { %s3126_s21 = smov 0   ;;  %s3128_s22 = smov 0  }
  0x16   :  { %s3130_s23 = smov 0   ;;  %s3132_s24 = smov 0  }
  0x17   :  { %s3134_s25 = smov 0   ;;  %s3136_s26 = smov 0  }
  0x18   :  { %s3138_s27 = smov 0   ;;  %s3140_s28 = smov 0  }
  0x19   :  { %s3142_s29 = smov 0   ;;  %s3144_s30 = smov 0  }
  0x1a LB: > { %3812 = sst [smem:[#allocation24_spill]] %s2996_s17  ;;  %s3187_s12 = sadd.s32 4294967295, %s3048_s30   ;;  %s3048_s30 = sphi %s3144_s30, %s36_s30   ;;  %s3044_s29 = sphi %s3142_s29, %s3873_s29   ;;  %s3040_s28 = sphi %s3140_s28, %s3882_s28   ;;  %s3036_s27 = sphi %s3138_s27, %s3881_s27   ;;  %s3032_s26 = sphi %s3136_s26, %s3870_s26   ;;  %s3028_s25 = sphi %s3134_s25, %s3880_s25   ;;  %s3024_s24 = sphi %s3132_s24, %s3879_s24   ;;  %s3020_s23 = sphi %s3130_s23, %s3878_s23   ;;  %s3016_s22 = sphi %s3128_s22, %s3877_s22   ;;  %s3012_s21 = sphi %s3126_s21, %s3876_s21   ;;  %s3008_s20 = sphi %s3124_s20, %s3875_s20   ;;  %s3004_s19 = sphi %s3122_s19, %s3866_s19   ;;  %s3000_s18 = sphi %s3120_s18, %s3865_s18   ;;  %s2996_s17 = sphi %s3118_s17, %s3864_s17  }
  0x1b   : > { %3813 = sst [smem:[#allocation25_spill]] %s3000_s18  ;;  %s2079_s13 = sadd.s32 4294967294, %s3048_s30  }
  0x1c   : > { %3814 = sst [smem:[#allocation26_spill]] %s3004_s19  ;;  %p70_p0 = scmp.ne.s32.totalorder %s3024_s24, %s3020_s23 }
  0x1d   : > { %3815 = sst [smem:[#allocation27_spill]] %s3016_s22  ;;  %p71_p1 = scmp.eq.s32.totalorder %s3187_s12, 0 }
  0x1e   : > { %3816 = sst [smem:[#allocation28_spill]] %s3032_s26  ;;  %p332_p2 = scmp.ne.s32.totalorder %s3004_s19, %s3000_s18 }
  0x1f   : > { %3817 = sst [smem:[#allocation29_spill]] %s3036_s27  ;;  %p3197_p3 = por %p71_p1, %p70_p0 }
  0x20   : > { %3818 = sst [smem:[#allocation30_spill]] %s3040_s28  ;;  %p333_p4 = scmp.eq.s32.totalorder %s3187_s12, 3 }
  0x21   : > { %3819 = sst [smem:[#allocation31_spill]] %s3044_s29  ;;  %p338_p5 = scmp.ne.s32.totalorder %s3000_s18, %s2996_s17 }
  0x22   : > { %3820 = sst [smem:[#allocation32_spill]] %s3048_s30  ;;  %p339_p6 = scmp.eq.s32.totalorder %s2079_s13, 3 }
  0x23   : > { %s3821_s15 = scalar_select %p3197_p3, 1, 0 }
  0x24   : > { %p3204_p7 = por %p333_p4, %p332_p2  ;;  %p2080_p8 = scmp.ge.s32.totalorder %s3048_s30, 1 }
  0x25   : > { %3822 = sst [smem:[#allocation33_spill]] %s3821_s15  ;;  %p3209_p9 = por %p339_p6, %p338_p5 }
  0x26   : > { %s3823_s16 = scalar_select %p3204_p7, 1, 0 }
  0x27   : > { %s3825_s23 = scalar_select %p3209_p9, 1, 0 }
  0x28   : > { %3824 = sst [smem:[#allocation34_spill]] %s3823_s16  ;;  %p346_p10 = scmp.lt.s32.totalorder %s3048_s30, 5 }
  0x29   : > { %3826 = sst [smem:[#allocation35_spill]] %s3825_s23  ;;  %s3050_s23 = smov [#allocation16]  }
  0x2a   : > { %s3827_s9 = sld [smem:[#allocation47_spill]]  ;;  %p3217_p11 = pnand %p2080_p8, %p346_p10 }
  0x2b   : > { %s368_s16 = sshll.u32 %s3050_s23, 4  ;;  %s3783_s11 = smov 128   ;;  %s369_s16 = int_to_ptr.vmem [resolvable:$true] %s368_s16 }
  0x2c   : > { %p2457_p12 = pneg %p3217_p11  ;;  %s3052_s14 = smov 8  }
  0x2d   : > { %s48_s27 = sadd.s32 1, %s3044_s29  ;;  %s57_s10 = sadd.s32 1, %s3028_s25 }
  0x2e   : > { %p2458_p13 = pnand %p2457_p12, %p71_p1  ;;  %p64_p2 = scmp.ne.s32.totalorder %s3028_s25, %s3024_s24 }
  0x2f   : > { %p65_p4 = scmp.eq.s32.totalorder %s3048_s30, 0  ;;  %p2485_p10 = scmp.lt.s32.totalorder %s3048_s30, 4 }
  0x30   : > { %s366_s17 = sshll.u32 %s3827_s9, 4  ;;  %s45_s9 = sadd.s32 1, %s3040_s28  ;;  %s367_s17 = int_to_ptr.hbm [resolvable:$true] %s366_s17 }
  0x31   : > { %2460 = dma.hbm_to_vmem [thread:$0]  (!%p2458_p13), %s367_s17, 2048, %s369_s16, [#allocation15], %s3783_s11, %s3783_s11, %s3052_s14  }
  0x32   : > { %p46_p0 = scmp.ge.s32.totalorder %s45_s9, 2  ;;  %p3243_p8 = por %p65_p4, %p64_p2 }
  0x33   : > { %s3790_s16 = sand.u32 1, %s3028_s25   ;;  %s2312_s14 = sshll.u32 %s3044_s29, 5 }
  0x34   : > { %s3884_s9 = smov (%p46_p0, %s45_s9), 0  ;;  %s3886_s27 = smov (!%p46_p0, %s48_s27), %s3044_s29 }
  0x35   : > { %3829 = sst [smem:[#allocation36_spill]] %s3884_s9  ;;  %s3237_s23 = ssub.s32 %s3040_s28, %s3884_s9 }
  0x36   : > { %p50_p5 = scmp.ge.s32.totalorder %s3886_s27, 2  ;;  %p137_p6 = scmp.eq.s32.totalorder %s3237_s23, 0 }
  0x37   : > { %s3256_s9 = sshll.u32 %s3790_s16, 6  ;;  %s394_s7 = sadd.s32 %s3040_s28, %s2312_s14 }
  0x38   : > { %s3888_s27 = smov (%p50_p5, %s3886_s27), 0  ;;  %s3832_s6 = sadd.s32 1, %s3004_s19 }
  0x39   : > { %3831 = sst [smem:[#allocation37_spill]] %s3888_s27  ;;  %s52_s11 = ssub.s32 %s3044_s29, %s3888_s27 }
  0x3a   : > { %s54_s8 = sor.u32 %s3237_s23, %s52_s11  ;;  %p320_p12 = scmp.eq.s32.totalorder %s52_s11, 0 }
  0x3b   : > { %p55_p13 = scmp.eq.s32.totalorder %s54_s8, 0  ;;  %s3268_s15 = sshll.u32 %s394_s7, 2 }
  0x3c   : > { %s3263_s26 = scalar_select %p320_p12, %s3004_s19, %s3832_s6  }
  0x3d   : > { %s3266_s18 = scalar_select %p55_p13, %s3028_s25, %s57_s10  }
  0x3e   : > { %3833 = sst [smem:[#allocation38_spill]] %s3263_s26  ;;  %p3274_p0 = pnand %p2485_p10, %p3243_p8 }
  0x3f   : > { %3834 = sst [smem:[#allocation39_spill]] %s3266_s18  ;;  %s3279_s6 = sand.u32 1, %s3048_s30  }
  0x40   : > { %s3836_s1 = sld [smem:[#allocation42_spill]]  ;;  %s413_s17 = scalar_lea.vmem [#allocation8], %s3256_s9 }
  0x41   : > { %s423_s14 = sshll.u32 %s413_s17, 4  ;;  %s3793_s27 = scalar_lea.sflag [#allocation9], %s3279_s6  ;;  %s424_s14 = int_to_ptr.vmem [resolvable:$true] %s423_s14 }
  0x42   : > { %s3794_s29 = smov 64   ;;  %s3796_s18 = smov 4  }
  0x43   : > { %s3837_s26 = smov 128   ;;  %s139_s11 = sadd.s32 1, %s3016_s22 }
  0x44   : > { %s3298_s10 = scalar_select %p137_p6, %s3016_s22, %s139_s11  }
  0x45   : > { %p146_p2 = scmp.ne.s32.totalorder %s3016_s22, %s3012_s21  ;;  %p152_p5 = scmp.ne.s32.totalorder %s3012_s21, %s3008_s20 }
  0x46   : > { %s420_s7 = scalar_lea.hbm %s3836_s1, %s3268_s15  ;;  %3838 = sst [smem:[#allocation40_spill]] %s3298_s10 }
  0x47   : > { %s421_s16 = sshll.u32 %s420_s7, 4  ;;  %s459_s7 = sand.u32 1, %s3016_s22   ;;  %s422_s16 = int_to_ptr.hbm [resolvable:$true] %s421_s16 }
  0x48   : > { %2467 = dma.hbm_to_vmem [thread:$0]  (!%p3274_p0), %s422_s16, 1024, %s424_s14, %s3793_s27, %s3837_s26, %s3794_s29, %s3796_s18  }
  0x49   : > { %p148_p8 = por %p146_p2, %p65_p4  ;;  %p3309_p12 = por %p152_p5, %p71_p1 }
  0x4a   : > { %s3313_s1 = sshll.u32 %s459_s7, 6  ;;  %s3316_s16 = sshll.u32 %s3040_s28, 6 }
  0x4b   : > { %s3840_s3 = sld [smem:[#allocation43_spill]]  ;;  %s461_s27 = scalar_lea.vmem [#allocation11], %s3313_s1 }
  0x4c   : > { %s469_s29 = sshll.u32 %s461_s27, 4  ;;  %p3325_p4 = pnand %p2485_p10, %p148_p8  ;;  %s470_s29 = int_to_ptr.vmem [resolvable:$true] %s469_s29 }
  0x4d   : > { %s3842_s0 = sld [smem:[#allocation41_spill]]  ;;  %s3844_s27 = smov 64  }
  0x4e   : > { %s389_s10 = scalar_lea.vmem [#allocation5], %s3256_s9  ;;  %s3845_s19 = sand.u32 1, %s3028_s25  }
  0x4f   : > { %s399_s22 = sshll.u32 %s389_s10, 4  ;;  %s386_s18 = scalar_lea.sflag [#allocation6], %s3845_s19  ;;  %s400_s22 = int_to_ptr.vmem [resolvable:$true] %s399_s22 }
  0x50   : > { %s437_s30 = scalar_lea.vmem [#allocation10], %s3256_s9  ;;  %s3846_s19 = scalar_lea.sflag [#allocation9], %s3279_s6 }
  0x51   : > { %s466_s20 = scalar_lea.hbm %s3840_s3, %s3316_s16  ;;  %s3843_s3 = smov 4  }
  0x52   : > { %s467_s11 = sshll.u32 %s466_s20, 4  ;;  %s458_s20 = scalar_lea.sflag [#allocation12], %s3279_s6  ;;  %s468_s11 = int_to_ptr.hbm [resolvable:$true] %s467_s11 }
  0x53   : > { %s396_s23 = scalar_lea.hbm %s3842_s0, %s3268_s15  ;;  %s444_s0 = scalar_lea.hbm %s3768_s2, %s3268_s15 }
  0x54   : > { %s397_s14 = sshll.u32 %s396_s23, 4  ;;  %s398_s14 = int_to_ptr.hbm [resolvable:$true] %s397_s14 }
  0x55   : > { %2473 = dma.hbm_to_vmem [thread:$0]  (!%p3325_p4), %s468_s11, 1024, %s470_s29, %s458_s20, %s3844_s27, %s3844_s27, %s3843_s3  }
  0x56   : > { %2464 = dma.hbm_to_vmem [thread:$0]  (!%p3274_p0), %s398_s14, 1024, %s400_s22, %s386_s18, %s3837_s26, %s3844_s27, %s3843_s3  }
  0x57   : > { %s447_s29 = sshll.u32 %s437_s30, 4  ;;  %s445_s11 = sshll.u32 %s444_s0, 4  ;;  %s448_s29 = int_to_ptr.vmem [resolvable:$true] %s447_s29  ;;  %s446_s11 = int_to_ptr.hbm [resolvable:$true] %s445_s11 }
  0x58   : > { %2470 = dma.hbm_to_vmem [thread:$0]  (!%p3274_p0), %s446_s11, 1024, %s448_s29, %s3846_s19, %s3837_s26, %s3844_s27, %s3843_s3  }
  0x59   : > { %s488_s14 = scalar_lea.hbm %s3770_s4, %s3316_s16  ;;  %s483_s18 = scalar_lea.vmem [#allocation13], %s3313_s1 }
  0x5a   : > { %s491_s15 = sshll.u32 %s483_s18, 4  ;;  %s489_s28 = sshll.u32 %s488_s14, 4  ;;  %s492_s15 = int_to_ptr.vmem [resolvable:$true] %s491_s15  ;;  %s490_s28 = int_to_ptr.hbm [resolvable:$true] %s489_s28 }
  0x5b   : > { %2476 = dma.hbm_to_vmem [thread:$0]  (!%p3325_p4), %s490_s28, 1024, %s492_s15, %s458_s20, %s3844_s27, %s3844_s27, %s3843_s3  }
  0x5c   : > { %s510_s30 = scalar_lea.hbm %s3771_s5, %s3316_s16  ;;  %s505_s26 = scalar_lea.vmem [#allocation14], %s3313_s1 }
  0x5d   : > { %s511_s8 = sshll.u32 %s510_s30, 4  ;;  %s513_s23 = sshll.u32 %s505_s26, 4  ;;  %s512_s8 = int_to_ptr.hbm [resolvable:$true] %s511_s8  ;;  %s514_s23 = int_to_ptr.vmem [resolvable:$true] %s513_s23 }
  0x5e   : > { %s502_s29 = scalar_lea.sflag [#allocation15], %s3279_s6  ;;  %525 = sbr.rel (%p3217_p11) target bundleno = 918 (0x396), region = 64 }
  0x5f   : > { %2479 = dma.hbm_to_vmem [thread:$0]  (!%p3325_p4), %s512_s8, 1024, %s514_s23, %s502_s29, %s3844_s27, %s3844_s27, %s3843_s3  }
  0x60   : > { %s527_s11 = sand.u32 (!%p3217_p11), 1, %s3024_s24  }
  0x61   : > { %s2105_s19 = sshll.u32 (!%p3217_p11), %s527_s11, 6  ;;  %s528_s10 = scalar_lea.sflag (!%p3217_p11), [#allocation6], %s527_s11 }
  0x62   : > { %s3383_s16 = scalar_lea.vmem (!%p3217_p11), [#allocation5], %s2105_s19 }
  0x63   : > { %2971 = dma.done.wait (%p3197_p3), %s528_s10, 1024  }
  0x64   : > { %2973 = vsyncadd (%p3197_p3), %s528_s10, 4294966272  ;;  %s537_s1 = sand.u32 1, %s3187_s12   ;;  %s3390_s3 = scalar_lea.vmem [#allocation8], %s2105_s19 }
  0x65   : > { %s538_s6 = scalar_lea.sflag [#allocation9], %s537_s1 }
  0x66   : > { %2975 = dma.done.wait (%p3197_p3), %s538_s6, 2048  }
  0x67   : > { %2977 = vsyncadd (%p3197_p3), %s538_s6, 4294965248  ;;  %s559_s13 = sand.u32 1, %s3012_s21   ;;  %s3397_s27 = scalar_lea.vmem [#allocation10], %s2105_s19 }
  0x68   : > { %s2108_s7 = sshll.u32 %s559_s13, 6  ;;  %s558_s22 = scalar_lea.sflag [#allocation12], %s537_s1 }
  0x69   : > { %s3399_s14 = scalar_lea.vmem [#allocation11], %s2108_s7 }
  0x6a   : > { %2979 = dma.done.wait (%p3309_p12), %s558_s22, 2048  }
  0x6b   : > { %2981 = vsyncadd (%p3309_p12), %s558_s22, 4294965248  ;;  %s3405_s18 = scalar_lea.vmem [#allocation13], %s2108_s7  ;;  %s578_s15 = scalar_lea.sflag [#allocation15], %s537_s1 }
  0x6c   : > { %s3407_s28 = scalar_lea.vmem [#allocation14], %s2108_s7 }
  0x6d   : > { %2983 = dma.done.wait (%p3309_p12), %s578_s15, 1024  }
  0x6e   : > { %2985 = vsyncadd (%p3309_p12), %s578_s15, 4294966272 }
  0x6f   : > { %2987 = dma.done.wait (%p71_p1), [#allocation15], 2048  }
  0x70   : > { %2989 = vsyncadd (%p71_p1), [#allocation15], 4294965248  ;;  %s3848_s0 = sld [smem:[#allocation25_spill]] }
  0x71   : > { %s3849_s26 = sld [smem:[#allocation28_spill]] }
  0x76   : > { %s648_s9 = sand.u32 1, %s3848_s0  }
  0x77   : > { %s2112_s30 = sshll.u32 %s648_s9, 7  ;;  %p2113_p3 = scmp.ne.s32.totalorder %s3849_s26, 0 }
  0x78   : > { %s3420_s8 = scalar_lea.vmem [#allocation17], %s2112_s30 }
  0x79   : > { %661 = sbr.rel (%p2113_p3) target bundleno = 175 (0xaf), region = 96 }
  0x7e   : > { %v3055_v0 = vmov 0.0  }
  0x7f   : > { %662 = vst [vmem:[#allocation2 + $0x30] sm:$0xff] %v3055_v0 }
  0x80   : > { %663 = vst [vmem:[#allocation2] sm:$0xff] %v3055_v0 }
  0x81   : > { %664 = vst [vmem:[#allocation2 + $0x58] sm:$0xff] %v3055_v0 }
  0x82   : > { %665 = vst [vmem:[#allocation2 + $0x18] sm:$0xff] %v3055_v0 }
  0x83   : > { %666 = vst [vmem:[#allocation2 + $0x50] sm:$0xff] %v3055_v0 }
  0x84   : > { %667 = vst [vmem:[#allocation2 + $0x68] sm:$0xff] %v3055_v0 }
  0x85   : > { %668 = vst [vmem:[#allocation2 + $0x8] sm:$0xff] %v3055_v0 }
  0x86   : > { %669 = vst [vmem:[#allocation2 + $0x48] sm:$0xff] %v3055_v0 }
  0x87   : > { %670 = vst [vmem:[#allocation2 + $0x40] sm:$0xff] %v3055_v0 }
  0x88   : > { %671 = vst [vmem:[#allocation2 + $0x20] sm:$0xff] %v3055_v0 }
  0x89   : > { %672 = vst [vmem:[#allocation2 + $0x10] sm:$0xff] %v3055_v0 }
  0x8a   : > { %673 = vst [vmem:[#allocation2 + $0x38] sm:$0xff] %v3055_v0 }
  0x8b   : > { %674 = vst [vmem:[#allocation2 + $0x60] sm:$0xff] %v3055_v0 }
  0x8c   : > { %675 = vst [vmem:[#allocation2 + $0x70] sm:$0xff] %v3055_v0 }
  0x8d   : > { %676 = vst [vmem:[#allocation2 + $0x78] sm:$0xff] %v3055_v0 }
  0x8e   : > { %677 = vst [vmem:[#allocation2 + $0x28] sm:$0xff] %v3055_v0 }
  0x8f   : > { %678 = vst [vmem:[#allocation3 + $0x28] sm:$0xff] %v3055_v0 }
  0x90   : > { %679 = vst [vmem:[#allocation3 + $0x68] sm:$0xff] %v3055_v0 }
  0x91   : > { %680 = vst [vmem:[#allocation3 + $0x10] sm:$0xff] %v3055_v0 }
  0x92   : > { %681 = vst [vmem:[#allocation3 + $0x40] sm:$0xff] %v3055_v0 }
  0x93   : > { %682 = vst [vmem:[#allocation3 + $0x48] sm:$0xff] %v3055_v0 }
  0x94   : > { %683 = vst [vmem:[#allocation3 + $0x30] sm:$0xff] %v3055_v0 }
  0x95   : > { %684 = vst [vmem:[#allocation3 + $0x70] sm:$0xff] %v3055_v0 }
  0x96   : > { %685 = vst [vmem:[#allocation3 + $0x38] sm:$0xff] %v3055_v0 }
  0x97   : > { %686 = vst [vmem:[#allocation3 + $0x20] sm:$0xff] %v3055_v0 }
  0x98   : > { %687 = vst [vmem:[#allocation3 + $0x78] sm:$0xff] %v3055_v0 }
  0x99   : > { %688 = vst [vmem:[#allocation3 + $0x18] sm:$0xff] %v3055_v0 }
  0x9a   : > { %689 = vst [vmem:[#allocation3 + $0x58] sm:$0xff] %v3055_v0 }
  0x9b   : > { %690 = vst [vmem:[#allocation3] sm:$0xff] %v3055_v0 }
  0x9c   : > { %691 = vst [vmem:[#allocation3 + $0x8] sm:$0xff] %v3055_v0 }
  0x9d   : > { %692 = vst [vmem:[#allocation3 + $0x60] sm:$0xff] %v3055_v0 }
  0x9e   : > { %693 = vst [vmem:[#allocation3 + $0x50] sm:$0xff] %v3055_v0 }
  0x9f   : > { %694 = vst [vmem:[#allocation4 + $0x8] sm:$0xff] %v3055_v0 }
  0xa0   : > { %695 = vst [vmem:[#allocation4] sm:$0xff] %v3055_v0 }
  0xa1   : > { %696 = vst [vmem:[#allocation4 + $0x48] sm:$0xff] %v3055_v0 }
  0xa2   : > { %697 = vst [vmem:[#allocation4 + $0x60] sm:$0xff] %v3055_v0 }
  0xa3   : > { %698 = vst [vmem:[#allocation4 + $0x68] sm:$0xff] %v3055_v0 }
  0xa4   : > { %699 = vst [vmem:[#allocation4 + $0x18] sm:$0xff] %v3055_v0 }
  0xa5   : > { %700 = vst [vmem:[#allocation4 + $0x10] sm:$0xff] %v3055_v0 }
  0xa6   : > { %701 = vst [vmem:[#allocation4 + $0x38] sm:$0xff] %v3055_v0 }
  0xa7   : > { %702 = vst [vmem:[#allocation4 + $0x40] sm:$0xff] %v3055_v0 }
  0xa8   : > { %703 = vst [vmem:[#allocation4 + $0x28] sm:$0xff] %v3055_v0 }
  0xa9   : > { %704 = vst [vmem:[#allocation4 + $0x70] sm:$0xff] %v3055_v0 }
  0xaa   : > { %705 = vst [vmem:[#allocation4 + $0x20] sm:$0xff] %v3055_v0 }
  0xab   : > { %706 = vst [vmem:[#allocation4 + $0x58] sm:$0xff] %v3055_v0 }
  0xac   : > { %707 = vst [vmem:[#allocation4 + $0x30] sm:$0xff] %v3055_v0 }
  0xad   : > { %708 = vst [vmem:[#allocation4 + $0x50] sm:$0xff] %v3055_v0 }
  0xae   : > { %709 = vst [vmem:[#allocation4 + $0x78] sm:$0xff] %v3055_v0 }
  0xaf PF: > { %v2333_v1 = vld [vmem:[%s3399_s14 + $0x38] sm:$0xff]  ;;  %v2332_v4 = vld [vmem:[%s3399_s14 + $0x30] sm:$0xff]  ;;  %v2331_v7 = vld [vmem:[%s3399_s14 + $0x28] sm:$0xff]  ;;  %s3850_s12 = sld [smem:[#allocation28_spill]] }
  0xb0   : > { %v2349_v2 = vld [vmem:[%s3405_s18 + $0x38] sm:$0xff]  ;;  %854 = vmatpush.bf16.msra.mxu0 %v2333_v1  ;;  %2367 = vmatpush.bf16.msra.mxu3 %v2333_v1  ;;  %v2348_v5 = vld [vmem:[%s3405_s18 + $0x30] sm:$0xff]  ;;  %v2347_v8 = vld [vmem:[%s3405_s18 + $0x28] sm:$0xff] }
  0xb1   : > { %v3426_v3 = vld [vmem:[%s3407_s28 + $0x38] sm:$0xff]  ;;  %1079 = vmatpush.bf16.msra.mxu1 %v2349_v2  ;;  %v3432_v6 = vld [vmem:[%s3407_s28 + $0x30] sm:$0xff]  ;;  %v3438_v9 = vld [vmem:[%s3407_s28 + $0x28] sm:$0xff] }
  0xb2   : > { %1304 = vmatpush.bf16.msra.mxu2 %v3426_v3  ;;  %v2330_v10 = vld [vmem:[%s3399_s14 + $0x20] sm:$0xff]  ;;  %v2329_v13 = vld [vmem:[%s3399_s14 + $0x18] sm:$0xff]  ;;  %v2328_v16 = vld [vmem:[%s3399_s14 + $0x10] sm:$0xff] }
  0xb3   : > { %v2346_v11 = vld [vmem:[%s3405_s18 + $0x20] sm:$0xff]  ;;  %v2345_v14 = vld [vmem:[%s3405_s18 + $0x18] sm:$0xff]  ;;  %v2344_v17 = vld [vmem:[%s3405_s18 + $0x10] sm:$0xff] }
  0xb4   : > { %855 = vmatpush.bf16.msra.mxu0 %v2332_v4  ;;  %2368 = vmatpush.bf16.msra.mxu3 %v2332_v4  ;;  %v3444_v12 = vld [vmem:[%s3407_s28 + $0x20] sm:$0xff]  ;;  %v3450_v15 = vld [vmem:[%s3407_s28 + $0x18] sm:$0xff]  ;;  %v3456_v18 = vld [vmem:[%s3407_s28 + $0x10] sm:$0xff] }
  0xb5   : > { %1080 = vmatpush.bf16.msra.mxu1 %v2348_v5  ;;  %v2327_v19 = vld [vmem:[%s3399_s14 + $0x8] sm:$0xff]  ;;  %v2326_v22 = vld [vmem:[%s3399_s14] sm:$0xff]  ;;  %v2324_v26 = vld [vmem:[%s3383_s16 + $0x30] sm:$0xff]  ;;  %p2306_p1 = scmp.ne.s32.totalorder %s3850_s12, 1 }
  0xb6   : > { %1305 = vmatpush.bf16.msra.mxu2 %v3432_v6  ;;  %v2343_v20 = vld [vmem:[%s3405_s18 + $0x8] sm:$0xff]  ;;  %v2342_v23 = vld [vmem:[%s3405_s18] sm:$0xff]  ;;  %v2325_v30 = vld [vmem:[%s3383_s16 + $0x38] sm:$0xff]  ;;  %s3851_s29 = sld [smem:[#allocation44_spill]] (!%p2306_p1) }
  0xb7   : > { %v2359_v21 = vld [vmem:[%s3407_s28 + $0x8] sm:$0xff]  ;;  %v2358_v24 = vld [vmem:[%s3407_s28] sm:$0xff]  ;;  %v2320_v33 = vld [vmem:[%s3383_s16 + $0x10] sm:$0xff]  ;;  %s3852_s19 = sld [smem:[#allocation45_spill]] (!%p2306_p1) }
  0xb8   : > { %856 = vmatpush.bf16.msra.mxu0 %v2331_v7  ;;  %2369 = vmatpush.bf16.msra.mxu3 %v2331_v7  ;;  %v2318_v25 = vld [vmem:[%s3383_s16] sm:$0xff]  ;;  %v2319_v29 = vld [vmem:[%s3383_s16 + $0x8] sm:$0xff]  ;;  %v2340_v34 = vld [vmem:[%s3390_s3 + $0x30] sm:$0xff]  ;;  %s3853_s1 = sld [smem:[#allocation46_spill]] (!%p2306_p1) }
  0xb9   : > { %1081 = vmatpush.bf16.msra.mxu1 %v2347_v8  ;;  %v2334_v27 = vld [vmem:[%s3390_s3] sm:$0xff]  ;;  %v2335_v31 = vld [vmem:[%s3390_s3 + $0x8] sm:$0xff]  ;;  %v2336_v35 = vld [vmem:[%s3390_s3 + $0x10] sm:$0xff]  ;;  %s3854_s13 = sld [smem:[#allocation48_spill]] (!%p2306_p1) }
  0xba   : > { %1306 = vmatpush.bf16.msra.mxu2 %v3438_v9  ;;  %v2350_v28 = vld [vmem:[%s3397_s27] sm:$0xff]  ;;  %v2351_v32 = vld [vmem:[%s3397_s27 + $0x8] sm:$0xff]  ;;  %v2352_v36 = vld [vmem:[%s3397_s27 + $0x10] sm:$0xff] }
  0xbb   : > { %v2321_v37 = vld [vmem:[%s3383_s16 + $0x18] sm:$0xff]  ;;  %v2322_v41 = vld [vmem:[%s3383_s16 + $0x20] sm:$0xff]  ;;  %v2356_v42 = vld [vmem:[%s3397_s27 + $0x30] sm:$0xff] }
  0xbc   : > { %857 = vmatpush.bf16.msra.mxu0 %v2330_v10  ;;  %2370 = vmatpush.bf16.msra.mxu3 %v2330_v10  ;;  %v2341_v38 = vld [vmem:[%s3390_s3 + $0x38] sm:$0xff]  ;;  %v2338_v43 = vld [vmem:[%s3390_s3 + $0x20] sm:$0xff]  ;;  %v2323_v45 = vld [vmem:[%s3383_s16 + $0x28] sm:$0xff] }
  0xbd   : > { %1082 = vmatpush.bf16.msra.mxu1 %v2346_v11  ;;  %v2337_v39 = vld [vmem:[%s3390_s3 + $0x18] sm:$0xff]  ;;  %v2354_v44 = vld [vmem:[%s3397_s27 + $0x20] sm:$0xff]  ;;  %v2339_v47 = vld [vmem:[%s3390_s3 + $0x28] sm:$0xff] }
  0xbe   : > { %1307 = vmatpush.bf16.msra.mxu2 %v3444_v12  ;;  %v2353_v40 = vld [vmem:[%s3397_s27 + $0x18] sm:$0xff]  ;;  %v2355_v48 = vld [vmem:[%s3397_s27 + $0x28] sm:$0xff]  ;;  %v710_v49 = vld [vmem:[#allocation2 + $0x30] sm:$0xff] }
  0xbf   : > { %v2357_v46 = vld [vmem:[%s3397_s27 + $0x38] sm:$0xff]  ;;  %v935_v50 = vld [vmem:[#allocation3 + $0x28] sm:$0xff]  ;;  %v722_v55 = vld [vmem:[#allocation2 + $0x60] sm:$0xff] }
  0xc0   : > { %858 = vmatpush.bf16.msra.mxu0 %v2329_v13  ;;  %2371 = vmatpush.bf16.msra.mxu3 %v2329_v13  ;;  %v1160_v56 = vld [vmem:[#allocation4 + $0x8] sm:$0xff]  ;;  %v711_v58 = vld [vmem:[#allocation2] sm:$0xff] }
  0xc1   : > { %1083 = vmatpush.bf16.msra.mxu1 %v2345_v14  ;;  %v936_v61 = vld [vmem:[#allocation3 + $0x68] sm:$0xff]  ;;  %v1161_v4 = vld [vmem:[#allocation4] sm:$0xff] }
  0xc2   : > { %1308 = vmatpush.bf16.msra.mxu2 %v3450_v15 }
  0xc4   : > { %859 = vmatpush.bf16.msra.mxu0 %v2328_v16  ;;  %2372 = vmatpush.bf16.msra.mxu3 %v2328_v16  ;;  %v1162_v16 = vld [vmem:[#allocation4 + $0x48] sm:$0xff] }
  0xc5   : > { %1084 = vmatpush.bf16.msra.mxu1 %v2344_v17 }
  0xc6   : > { %1309 = vmatpush.bf16.msra.mxu2 %v3456_v18 }
  0xc8   : > { %860 = vmatpush.bf16.msra.mxu0 %v2327_v19  ;;  %2373 = vmatpush.bf16.msra.mxu3 %v2327_v19 }
  0xc9   : > { %1085 = vmatpush.bf16.msra.mxu1 %v2343_v20 }
  0xca   : > { %1310 = vmatpush.bf16.msra.mxu2 %v2359_v21 }
  0xcc   : > { %861 = vmatpush.bf16.msra.mxu0 %v2326_v22  ;;  %2374 = vmatpush.bf16.msra.mxu3 %v2326_v22 }
  0xcd   : > { %1086 = vmatpush.bf16.msra.mxu1 %v2342_v23 }
  0xce   : > { %1311 = vmatpush.bf16.msra.mxu2 %v2358_v24 }
  0xcf   : > { %862 = vmatmul.bf16.vlgmr.msra.gmra.mxu0 %v2318_v25  ;;  %892 = vmatmul.bf16.vlgmr.msra.gmra.mxu3 %v2324_v26 }
  0xd0   : > { %2375 = vmatpush.bf16.msrb.mxu3 %v2349_v2  ;;  %1087 = vmatmul.bf16.vlgmr.msra.gmra.mxu1 %v2334_v27  ;;  %v725_v27 = vld [vmem:[#allocation2 + $0x28] sm:$0xff] }
  0xd1   : > { %1312 = vmatmul.bf16.vlgmr.msra.gmra.mxu2 %v2350_v28  ;;  %v1163_v28 = vld [vmem:[#allocation4 + $0x60] sm:$0xff] }
  0xd4   : > { %2376 = vmatpush.bf16.msrb.mxu3 %v2348_v5 }
  0xd8   : > { %2377 = vmatpush.bf16.msrb.mxu3 %v2347_v8 }
  0xdc   : > { %2378 = vmatpush.bf16.msrb.mxu3 %v2346_v11 }
  0xdf   : > { %867 = vmatmul.bf16.gmra.mxu0 %v2319_v29  ;;  %897 = vmatmul.bf16.gmra.mxu3 %v2325_v30  ;;  %v714_v30 = vld [vmem:[#allocation2 + $0x50] sm:$0xff] }
  0xe0   : > { %2379 = vmatpush.bf16.msrb.mxu3 %v2345_v14  ;;  %1092 = vmatmul.bf16.gmra.mxu1 %v2335_v31 }
  0xe1   : > { %1317 = vmatmul.bf16.gmra.mxu2 %v2351_v32 }
  0xe4   : > { %2380 = vmatpush.bf16.msrb.mxu3 %v2344_v17 }
  0xe8   : > { %2381 = vmatpush.bf16.msrb.mxu3 %v2343_v20 }
  0xec   : > { %2382 = vmatpush.bf16.msrb.mxu3 %v2342_v23 }
  0xef   : > { %872 = vmatmul.bf16.gmra.mxu0 %v2320_v33  ;;  %1117 = vmatmul.bf16.vlgmr.msrb.gmra.mxu3 %v2340_v34  ;;  %v939_v33 = vld [vmem:[#allocation3 + $0x48] sm:$0xff] }
  0xf0   : > { %2383 = vmatpush.bf16.msra.mxu3 %v3426_v3  ;;  %1097 = vmatmul.bf16.gmra.mxu1 %v2336_v35  ;;  %v723_v3 = vld [vmem:[#allocation2 + $0x70] sm:$0xff] }
  0xf1   : > { %1322 = vmatmul.bf16.gmra.mxu2 %v2352_v36 }
  0xf4   : > { %2384 = vmatpush.bf16.msra.mxu3 %v3432_v6  ;;  %v712_v6 = vld [vmem:[#allocation2 + $0x58] sm:$0xff] }
  0xf8   : > { %2385 = vmatpush.bf16.msra.mxu3 %v3438_v9  ;;  %v937_v9 = vld [vmem:[#allocation3 + $0x10] sm:$0xff] }
  0xfc   : > { %2386 = vmatpush.bf16.msra.mxu3 %v3444_v12 }
  0xff   : > { %877 = vmatmul.bf16.gmra.mxu0 %v2321_v37  ;;  %1122 = vmatmul.bf16.gmra.mxu3 %v2341_v38 }
 0x100   : > { %2387 = vmatpush.bf16.msra.mxu3 %v3450_v15  ;;  %1102 = vmatmul.bf16.gmra.mxu1 %v2337_v39  ;;  %v724_v15 = vld [vmem:[#allocation2 + $0x78] sm:$0xff]  ;;  %v947_v39 = vld [vmem:[#allocation3] sm:$0xff] }
 0x101   : > { %1327 = vmatmul.bf16.gmra.mxu2 %v2353_v40  ;;  %v1164_v40 = vld [vmem:[#allocation4 + $0x68] sm:$0xff] }
 0x104   : > { %2388 = vmatpush.bf16.msra.mxu3 %v3456_v18  ;;  %v713_v18 = vld [vmem:[#allocation2 + $0x18] sm:$0xff] }
 0x108   : > { %2389 = vmatpush.bf16.msra.mxu3 %v2359_v21  ;;  %v938_v21 = vld [vmem:[#allocation3 + $0x40] sm:$0xff] }
 0x10c   : > { %2390 = vmatpush.bf16.msra.mxu3 %v2358_v24 }
 0x10f   : > { %882 = vmatmul.bf16.gmra.mxu0 %v2322_v41  ;;  %1342 = vmatmul.bf16.vlgmr.msra.gmra.mxu3 %v2356_v42  ;;  %v715_v42 = vld [vmem:[#allocation2 + $0x68] sm:$0xff] }
 0x110   : > { %1107 = vmatmul.bf16.gmra.mxu1 %v2338_v43 }
 0x111   : > { %1332 = vmatmul.bf16.gmra.mxu2 %v2354_v44 }
 0x11f   : > { %887 = vmatmul.bf16.gmra.mxu0 %v2323_v45  ;;  %1347 = vmatmul.bf16.gmra.mxu3 %v2357_v46  ;;  %v940_v45 = vld [vmem:[#allocation3 + $0x30] sm:$0xff] }
 0x120   : > { %1112 = vmatmul.bf16.gmra.mxu1 %v2339_v47 }
 0x121   : > { %1337 = vmatmul.bf16.gmra.mxu2 %v2355_v48 }
 0x14c   : > { %v863_v51 = vpop.f32.mrf.mxu0 }
 0x14d   : > { %v903_v52 = vadd.f32 %v863_v51, %v710_v49  ;;  %v1088_v53 = vpop.f32.mrf.mxu1  ;;  %v948_v51 = vld [vmem:[#allocation3 + $0x8] sm:$0xff] }
 0x14e   : > { %v1128_v54 = vadd.f32 %v1088_v53, %v935_v50 }
 0x14f   : > { %919 = vst [vmem:[#allocation2 + $0x30] sm:$0xff] %v903_v52  ;;  %v1165_v52 = vld [vmem:[#allocation4 + $0x18] sm:$0xff] }
 0x150   : > { %1144 = vst [vmem:[#allocation3 + $0x28] sm:$0xff] %v1128_v54  ;;  %v716_v54 = vld [vmem:[#allocation2 + $0x8] sm:$0xff] }
 0x152   : > { %v893_v57 = vpop.f32.mrf.mxu3 }
 0x153   : > { %v915_v59 = vadd.f32 %v893_v57, %v722_v55  ;;  %v941_v57 = vld [vmem:[#allocation3 + $0x70] sm:$0xff] }
 0x154   : > { %v1313_v60 = vpop.f32.mrf.mxu2  ;;  %v865_v63 = vpop.f32.mrf.mxu0 }
 0x155   : > { %v1353_v62 = vadd.f32 %v1313_v60, %v1160_v56  ;;  %931 = vst [vmem:[#allocation2 + $0x60] sm:$0xff] %v915_v59  ;;  %v904_v0 = vadd.f32 %v865_v63, %v711_v58  ;;  %v1090_v1 = vpop.f32.mrf.mxu1  ;;  %v949_v63 = vld [vmem:[#allocation3 + $0x60] sm:$0xff] }
 0x156   : > { %v1129_v2 = vadd.f32 %v1090_v1, %v936_v61 }
 0x157   : > { %1369 = vst [vmem:[#allocation4 + $0x8] sm:$0xff] %v1353_v62 }
 0x158   : > { %920 = vst [vmem:[#allocation2] sm:$0xff] %v904_v0  ;;  %v1166_v0 = vld [vmem:[#allocation4 + $0x10] sm:$0xff] }
 0x159   : > { %1145 = vst [vmem:[#allocation3 + $0x68] sm:$0xff] %v1129_v2  ;;  %v717_v2 = vld [vmem:[#allocation2 + $0x48] sm:$0xff] }
 0x15a   : > { %v895_v5 = vpop.f32.mrf.mxu3 }
 0x15b   : > { %v916_v7 = vadd.f32 %v895_v5, %v723_v3  ;;  %v942_v5 = vld [vmem:[#allocation3 + $0x38] sm:$0xff] }
 0x15c   : > { %v1315_v8 = vpop.f32.mrf.mxu2  ;;  %v868_v11 = vpop.f32.mrf.mxu0 }
 0x15d   : > { %v1354_v10 = vadd.f32 %v1315_v8, %v1161_v4  ;;  %932 = vst [vmem:[#allocation2 + $0x70] sm:$0xff] %v916_v7  ;;  %v905_v12 = vadd.f32 %v868_v11, %v712_v6  ;;  %v1093_v13 = vpop.f32.mrf.mxu1  ;;  %v950_v11 = vld [vmem:[#allocation3 + $0x50] sm:$0xff] }
 0x15e   : > { %v1130_v14 = vadd.f32 %v1093_v13, %v937_v9 }
 0x15f   : > { %1370 = vst [vmem:[#allocation4] sm:$0xff] %v1354_v10 }
 0x160   : > { %921 = vst [vmem:[#allocation2 + $0x58] sm:$0xff] %v905_v12  ;;  %v1167_v12 = vld [vmem:[#allocation4 + $0x38] sm:$0xff] }
 0x161   : > { %1146 = vst [vmem:[#allocation3 + $0x10] sm:$0xff] %v1130_v14  ;;  %v718_v14 = vld [vmem:[#allocation2 + $0x40] sm:$0xff] }
 0x162   : > { %v898_v17 = vpop.f32.mrf.mxu3 }
 0x163   : > { %v917_v19 = vadd.f32 %v898_v17, %v724_v15  ;;  %v943_v17 = vld [vmem:[#allocation3 + $0x20] sm:$0xff] }
 0x164   : > { %v1318_v20 = vpop.f32.mrf.mxu2  ;;  %v870_v23 = vpop.f32.mrf.mxu0 }
 0x165   : > { %v1355_v22 = vadd.f32 %v1318_v20, %v1162_v16  ;;  %933 = vst [vmem:[#allocation2 + $0x78] sm:$0xff] %v917_v19  ;;  %v906_v24 = vadd.f32 %v870_v23, %v713_v18  ;;  %v1095_v25 = vpop.f32.mrf.mxu1  ;;  %v1172_v23 = vld [vmem:[#allocation4 + $0x58] sm:$0xff] }
 0x166   : > { %v1131_v26 = vadd.f32 %v1095_v25, %v938_v21 }
 0x167   : > { %1371 = vst [vmem:[#allocation4 + $0x48] sm:$0xff] %v1355_v22 }
 0x168   : > { %922 = vst [vmem:[#allocation2 + $0x18] sm:$0xff] %v906_v24  ;;  %v1168_v24 = vld [vmem:[#allocation4 + $0x40] sm:$0xff] }
 0x169   : > { %1147 = vst [vmem:[#allocation3 + $0x40] sm:$0xff] %v1131_v26  ;;  %v719_v26 = vld [vmem:[#allocation2 + $0x20] sm:$0xff] }
 0x16a   : > { %v900_v29 = vpop.f32.mrf.mxu3 }
 0x16b   : > { %v918_v31 = vadd.f32 %v900_v29, %v725_v27  ;;  %v944_v29 = vld [vmem:[#allocation3 + $0x78] sm:$0xff] }
 0x16c   : > { %v1320_v32 = vpop.f32.mrf.mxu2  ;;  %v873_v35 = vpop.f32.mrf.mxu0 }
 0x16d   : > { %v1356_v34 = vadd.f32 %v1320_v32, %v1163_v28  ;;  %934 = vst [vmem:[#allocation2 + $0x28] sm:$0xff] %v918_v31  ;;  %v907_v36 = vadd.f32 %v873_v35, %v714_v30  ;;  %v1098_v37 = vpop.f32.mrf.mxu1  ;;  %v1173_v35 = vld [vmem:[#allocation4 + $0x30] sm:$0xff] }
 0x16e   : > { %v1132_v38 = vadd.f32 %v1098_v37, %v939_v33 }
 0x16f   : > { %1372 = vst [vmem:[#allocation4 + $0x60] sm:$0xff] %v1356_v34 }
 0x170   : > { %923 = vst [vmem:[#allocation2 + $0x50] sm:$0xff] %v907_v36  ;;  %v1169_v36 = vld [vmem:[#allocation4 + $0x28] sm:$0xff] }
 0x171   : > { %1148 = vst [vmem:[#allocation3 + $0x48] sm:$0xff] %v1132_v38  ;;  %v720_v38 = vld [vmem:[#allocation2 + $0x10] sm:$0xff] }
 0x172   : > { %v1118_v41 = vpop.f32.mrf.mxu3 }
 0x173   : > { %v1140_v43 = vadd.f32 %v1118_v41, %v947_v39  ;;  %v945_v41 = vld [vmem:[#allocation3 + $0x18] sm:$0xff] }
 0x174   : > { %v1323_v44 = vpop.f32.mrf.mxu2  ;;  %v875_v47 = vpop.f32.mrf.mxu0 }
 0x175   : > { %v1357_v46 = vadd.f32 %v1323_v44, %v1164_v40  ;;  %1156 = vst [vmem:[#allocation3] sm:$0xff] %v1140_v43  ;;  %v908_v48 = vadd.f32 %v875_v47, %v715_v42  ;;  %v1100_v49 = vpop.f32.mrf.mxu1  ;;  %v1174_v47 = vld [vmem:[#allocation4 + $0x50] sm:$0xff] }
 0x176   : > { %v1133_v50 = vadd.f32 %v1100_v49, %v940_v45 }
 0x177   : > { %1373 = vst [vmem:[#allocation4 + $0x68] sm:$0xff] %v1357_v46 }
 0x178   : > { %924 = vst [vmem:[#allocation2 + $0x68] sm:$0xff] %v908_v48  ;;  %v1170_v48 = vld [vmem:[#allocation4 + $0x70] sm:$0xff] }
 0x179   : > { %1149 = vst [vmem:[#allocation3 + $0x30] sm:$0xff] %v1133_v50  ;;  %v721_v50 = vld [vmem:[#allocation2 + $0x38] sm:$0xff] }
 0x17a   : > { %v1120_v53 = vpop.f32.mrf.mxu3 }
 0x17b   : > { %v1141_v55 = vadd.f32 %v1120_v53, %v948_v51  ;;  %v946_v53 = vld [vmem:[#allocation3 + $0x58] sm:$0xff] }
 0x17c   : > { %v1325_v56 = vpop.f32.mrf.mxu2  ;;  %v878_v59 = vpop.f32.mrf.mxu0 }
 0x17d   : > { %v1358_v58 = vadd.f32 %v1325_v56, %v1165_v52  ;;  %1157 = vst [vmem:[#allocation3 + $0x8] sm:$0xff] %v1141_v55  ;;  %v909_v60 = vadd.f32 %v878_v59, %v716_v54  ;;  %v1103_v61 = vpop.f32.mrf.mxu1  ;;  %v1175_v59 = vld [vmem:[#allocation4 + $0x78] sm:$0xff] }
 0x17e   : > { %v1134_v62 = vadd.f32 %v1103_v61, %v941_v57 }
 0x17f   : > { %1374 = vst [vmem:[#allocation4 + $0x18] sm:$0xff] %v1358_v58 }
 0x180   : > { %925 = vst [vmem:[#allocation2 + $0x8] sm:$0xff] %v909_v60  ;;  %v1171_v60 = vld [vmem:[#allocation4 + $0x20] sm:$0xff] }
 0x181   : > { %1150 = vst [vmem:[#allocation3 + $0x70] sm:$0xff] %v1134_v62 }
 0x182   : > { %v1123_v1 = vpop.f32.mrf.mxu3 }
 0x183   : > { %v1142_v3 = vadd.f32 %v1123_v1, %v949_v63 }
 0x184   : > { %v1328_v4 = vpop.f32.mrf.mxu2  ;;  %v880_v7 = vpop.f32.mrf.mxu0 }
 0x185   : > { %v1359_v6 = vadd.f32 %v1328_v4, %v1166_v0  ;;  %1158 = vst [vmem:[#allocation3 + $0x60] sm:$0xff] %v1142_v3  ;;  %v910_v8 = vadd.f32 %v880_v7, %v717_v2  ;;  %v1105_v9 = vpop.f32.mrf.mxu1 }
 0x186   : > { %v1135_v10 = vadd.f32 %v1105_v9, %v942_v5 }
 0x187   : > { %1375 = vst [vmem:[#allocation4 + $0x10] sm:$0xff] %v1359_v6 }
 0x188   : > { %926 = vst [vmem:[#allocation2 + $0x48] sm:$0xff] %v910_v8 }
 0x189   : > { %1151 = vst [vmem:[#allocation3 + $0x38] sm:$0xff] %v1135_v10 }
 0x18a   : > { %v1125_v13 = vpop.f32.mrf.mxu3 }
 0x18b   : > { %v1143_v15 = vadd.f32 %v1125_v13, %v950_v11 }
 0x18c   : > { %v1330_v16 = vpop.f32.mrf.mxu2  ;;  %v883_v19 = vpop.f32.mrf.mxu0 }
 0x18d   : > { %v1360_v18 = vadd.f32 %v1330_v16, %v1167_v12  ;;  %1159 = vst [vmem:[#allocation3 + $0x50] sm:$0xff] %v1143_v15  ;;  %v911_v20 = vadd.f32 %v883_v19, %v718_v14  ;;  %v1108_v21 = vpop.f32.mrf.mxu1 }
 0x18e   : > { %v1136_v22 = vadd.f32 %v1108_v21, %v943_v17 }
 0x18f   : > { %1376 = vst [vmem:[#allocation4 + $0x38] sm:$0xff] %v1360_v18 }
 0x190   : > { %927 = vst [vmem:[#allocation2 + $0x40] sm:$0xff] %v911_v20 }
 0x191   : > { %1152 = vst [vmem:[#allocation3 + $0x20] sm:$0xff] %v1136_v22 }
 0x192   : > { %v1343_v25 = vpop.f32.mrf.mxu3 }
 0x193   : > { %v1365_v28 = vadd.f32 %v1343_v25, %v1172_v23 }
 0x194   : > { %v1333_v27 = vpop.f32.mrf.mxu2  ;;  %v885_v31 = vpop.f32.mrf.mxu0 }
 0x195   : > { %v1361_v30 = vadd.f32 %v1333_v27, %v1168_v24  ;;  %1381 = vst [vmem:[#allocation4 + $0x58] sm:$0xff] %v1365_v28  ;;  %v912_v32 = vadd.f32 %v885_v31, %v719_v26  ;;  %v1110_v33 = vpop.f32.mrf.mxu1 }
 0x196   : > { %v1137_v34 = vadd.f32 %v1110_v33, %v944_v29 }
 0x197   : > { %1377 = vst [vmem:[#allocation4 + $0x40] sm:$0xff] %v1361_v30 }
 0x198   : > { %928 = vst [vmem:[#allocation2 + $0x20] sm:$0xff] %v912_v32 }
 0x199   : > { %1153 = vst [vmem:[#allocation3 + $0x78] sm:$0xff] %v1137_v34 }
 0x19a   : > { %v1345_v37 = vpop.f32.mrf.mxu3 }
 0x19b   : > { %v1366_v40 = vadd.f32 %v1345_v37, %v1173_v35 }
 0x19c   : > { %v1335_v39 = vpop.f32.mrf.mxu2  ;;  %v888_v43 = vpop.f32.mrf.mxu0 }
 0x19d   : > { %v1362_v42 = vadd.f32 %v1335_v39, %v1169_v36  ;;  %1382 = vst [vmem:[#allocation4 + $0x30] sm:$0xff] %v1366_v40  ;;  %v913_v44 = vadd.f32 %v888_v43, %v720_v38  ;;  %v1113_v45 = vpop.f32.mrf.mxu1 }
 0x19e   : > { %v1138_v46 = vadd.f32 %v1113_v45, %v945_v41 }
 0x19f   : > { %1378 = vst [vmem:[#allocation4 + $0x28] sm:$0xff] %v1362_v42 }
 0x1a0   : > { %929 = vst [vmem:[#allocation2 + $0x10] sm:$0xff] %v913_v44 }
 0x1a1   : > { %1154 = vst [vmem:[#allocation3 + $0x18] sm:$0xff] %v1138_v46 }
 0x1a2   : > { %v1348_v49 = vpop.f32.mrf.mxu3 }
 0x1a3   : > { %v1367_v52 = vadd.f32 %v1348_v49, %v1174_v47 }
 0x1a4   : > { %v1338_v51 = vpop.f32.mrf.mxu2  ;;  %v890_v55 = vpop.f32.mrf.mxu0 }
 0x1a5   : > { %v1363_v54 = vadd.f32 %v1338_v51, %v1170_v48  ;;  %1383 = vst [vmem:[#allocation4 + $0x50] sm:$0xff] %v1367_v52  ;;  %v914_v56 = vadd.f32 %v890_v55, %v721_v50  ;;  %v1115_v57 = vpop.f32.mrf.mxu1 }
 0x1a6   : > { %v1139_v58 = vadd.f32 %v1115_v57, %v946_v53 }
 0x1a7   : > { %1379 = vst [vmem:[#allocation4 + $0x70] sm:$0xff] %v1363_v54 }
 0x1a8   : > { %930 = vst [vmem:[#allocation2 + $0x38] sm:$0xff] %v914_v56 }
 0x1a9   : > { %1155 = vst [vmem:[#allocation3 + $0x58] sm:$0xff] %v1139_v58 }
 0x1aa   : > { %v1350_v61 = vpop.f32.mrf.mxu3 }
 0x1ab   : > { %v1368_v63 = vadd.f32 %v1350_v61, %v1175_v59  ;;  %1388 = sbr.rel (%p2306_p1) target bundleno = 896 (0x380), region = 100 }
 0x1ac   : > { %v1340_v62 = vpop.f32.mrf.mxu2 }
 0x1ad   : > { %v1364_v0 = vadd.f32 %v1340_v62, %v1171_v60  ;;  %1384 = vst [vmem:[#allocation4 + $0x78] sm:$0xff] %v1368_v63 }
 0x1af   : > { %1380 = vst [vmem:[#allocation4 + $0x20] sm:$0xff] %v1364_v0 }
 0x1b0   : > { %v1608_v1 = vld [vmem:[#allocation16 + $0x78] sm:$0xff]  ;;  %v1607_v2 = vld [vmem:[#allocation16 + $0x70] sm:$0xff]  ;;  %v1606_v3 = vld [vmem:[#allocation16 + $0x68] sm:$0xff] }
 0x1b1   : > { %1613 = vmatpush.msra.mxu0 %v1608_v1  ;;  %2391 = vmatpush.msra.mxu1 %v1608_v1  ;;  %v1605_v4 = vld [vmem:[#allocation16 + $0x60] sm:$0xff]  ;;  %v1604_v5 = vld [vmem:[#allocation16 + $0x58] sm:$0xff]  ;;  %v1389_v6 = vld [vmem:[#allocation2 + $0x30] sm:$0xff] }
 0x1b2   : > { %2392 = vmatpush.msra.mxu2 %v1608_v1  ;;  %2393 = vmatpush.msra.mxu3 %v1608_v1  ;;  %v1603_v7 = vld [vmem:[#allocation16 + $0x50] sm:$0xff]  ;;  %v3499_v8 = vld [vmem:[%s3851_s29] ss:$0 sm:$0xff]  ;;  %v1441_v9 = vld [vmem:[#allocation3 + $0x28] sm:$0xff] }
 0x1b3   : > { %1614 = vmatpush.msra.mxu0 %v1607_v2  ;;  %2394 = vmatpush.msra.mxu1 %v1607_v2  ;;  %v3504_v10 = vld [vmem:[%s3852_s19] ss:$0 sm:$0xff]  ;;  %v1493_v11 = vld [vmem:[#allocation4 + $0x8] sm:$0xff]  ;;  %v1409_v12 = vadd.f32 %v3499_v8, %v1389_v6  ;;  %v1393_v14 = vld [vmem:[#allocation2 + $0x50] sm:$0xff] }
 0x1b4   : > { %2395 = vmatpush.msra.mxu2 %v1607_v2  ;;  %2396 = vmatpush.msra.mxu3 %v1607_v2  ;;  %v3510_v13 = vld [vmem:[%s3853_s1] ss:$0 sm:$0xff]  ;;  %v1445_v15 = vld [vmem:[#allocation3 + $0x48] sm:$0xff]  ;;  %v1461_v16 = vadd.f32 %v3504_v10, %v1441_v9  ;;  %v1413_v17 = vadd.f32 %v3499_v8, %v1393_v14  ;;  %v1505_v40 = vld [vmem:[#allocation4 + $0x58] sm:$0xff] }
 0x1b5   : > { %1615 = vmatpush.msra.mxu0 %v1606_v3  ;;  %2397 = vmatpush.msra.mxu1 %v1606_v3  ;;  %v1465_v18 = vadd.f32 %v3504_v10, %v1445_v15  ;;  %v1497_v19 = vld [vmem:[#allocation4 + $0x68] sm:$0xff]  ;;  %v1397_v20 = vld [vmem:[#allocation2 + $0x40] sm:$0xff]  ;;  %v1425_v23 = vmax.f32 %v1409_v12, 0.0  ;;  %v1513_v28 = vadd.f32 %v3510_v13, %v1493_v11  ;;  %v1600_v42 = vld [vmem:[#allocation16 + $0x38] sm:$0xff]  ;;  %v3524_v54 = vadd.f32 %v3510_v13, %v1505_v40 }
 0x1b6   : > { %2398 = vmatpush.msra.mxu2 %v1606_v3  ;;  %2399 = vmatpush.msra.mxu3 %v1606_v3  ;;  %v1449_v21 = vld [vmem:[#allocation3 + $0x20] sm:$0xff]  ;;  %v1602_v22 = vld [vmem:[#allocation16 + $0x48] sm:$0xff]  ;;  %v1417_v24 = vadd.f32 %v3499_v8, %v1397_v20  ;;  %v1477_v27 = vmax.f32 %v1461_v16, 0.0  ;;  %v1517_v29 = vadd.f32 %v3510_v13, %v1497_v19  ;;  %v1429_v34 = vmax.f32 %v1413_v17, 0.0  ;;  %v1450_v50 = vld [vmem:[#allocation3 + $0x78] sm:$0xff] }
 0x1b7   : > { %1616 = vmatpush.msra.mxu0 %v1605_v4  ;;  %2400 = vmatpush.msra.mxu1 %v1605_v4  ;;  %v1501_v25 = vld [vmem:[#allocation4 + $0x40] sm:$0xff]  ;;  %v1469_v30 = vadd.f32 %v3504_v10, %v1449_v21  ;;  %v1481_v35 = vmax.f32 %v1465_v18, 0.0  ;;  %v1442_v41 = vld [vmem:[#allocation3 + $0x68] sm:$0xff]  ;;  %v1529_v45 = vmax.f32 %v1513_v28, 0.0  ;;  %v1599_v51 = vld [vmem:[#allocation16 + $0x30] sm:$0xff]  ;;  %v1470_v1 = vadd.f32 %v3504_v10, %v1450_v50 }
 0x1b8   : > { %2401 = vmatpush.msra.mxu2 %v1605_v4  ;;  %2402 = vmatpush.msra.mxu3 %v1605_v4  ;;  %v1401_v26 = vld [vmem:[#allocation2 + $0x60] sm:$0xff]  ;;  %v1521_v36 = vadd.f32 %v3510_v13, %v1501_v25  ;;  %v1433_v37 = vmax.f32 %v1417_v24, 0.0  ;;  %v1545_v46 = vadd.f32 %v1477_v27, %v1425_v23  ;;  %v1533_v47 = vmax.f32 %v1517_v29, 0.0  ;;  %v1502_v56 = vld [vmem:[#allocation4 + $0x28] sm:$0xff]  ;;  %v1391_v3 = vld [vmem:[#allocation2 + $0x58] sm:$0xff] }
 0x1b9   : > { %1617 = vmatpush.msra.mxu0 %v1604_v5  ;;  %2403 = vmatpush.msra.mxu1 %v1604_v5  ;;  %v1453_v31 = vld [vmem:[#allocation3] sm:$0xff]  ;;  %v1485_v38 = vmax.f32 %v1469_v30, 0.0  ;;  %v1421_v39 = vadd.f32 %v3499_v8, %v1401_v26  ;;  %v1549_v52 = vadd.f32 %v1481_v35, %v1429_v34  ;;  %v1462_v55 = vadd.f32 %v3504_v10, %v1442_v41  ;;  %v1598_v61 = vld [vmem:[#allocation16 + $0x28] sm:$0xff]  ;;  %v1443_v12 = vld [vmem:[#allocation3 + $0x10] sm:$0xff] }
 0x1ba   : > { %2404 = vmatpush.msra.mxu2 %v1604_v5  ;;  %2405 = vmatpush.msra.mxu3 %v1604_v5  ;;  %v1390_v32 = vld [vmem:[#allocation2] sm:$0xff]  ;;  %v1473_v43 = vadd.f32 %v3504_v10, %v1453_v31  ;;  %v1537_v53 = vmax.f32 %v1521_v36, 0.0  ;;  %v1522_v2 = vadd.f32 %v3510_v13, %v1502_v56  ;;  %v1394_v4 = vld [vmem:[#allocation2 + $0x68] sm:$0xff]  ;;  %v3533_v6 = vadd.f32 %v1545_v46, %v1529_v45  ;;  %v1446_v14 = vld [vmem:[#allocation3 + $0x30] sm:$0xff] }
 0x1bb   : > { %1618 = vmatpush.msra.mxu0 %v1603_v7  ;;  %2406 = vmatpush.msra.mxu1 %v1603_v7  ;;  %v1601_v33 = vld [vmem:[#allocation16 + $0x40] sm:$0xff]  ;;  %v1410_v44 = vadd.f32 %v3499_v8, %v1390_v32  ;;  %v1553_v57 = vadd.f32 %v1485_v38, %v1433_v37  ;;  %v1437_v58 = vmax.f32 %v1421_v39, 0.0  ;;  %v1478_v62 = vmax.f32 %v1462_v55, 0.0  ;;  %v1498_v18 = vld [vmem:[#allocation4 + $0x18] sm:$0xff]  ;;  %v1399_v19 = vld [vmem:[#allocation2 + $0x10] sm:$0xff] }
 0x1bc   : > { %2407 = vmatpush.msra.mxu2 %v1603_v7  ;;  %2408 = vmatpush.msra.mxu3 %v1603_v7  ;;  %v1494_v48 = vld [vmem:[#allocation4] sm:$0xff]  ;;  %v1489_v59 = vmax.f32 %v1473_v43, 0.0  ;;  %v3535_v7 = vadd.f32 %v1549_v52, %v1533_v47  ;;  %v1486_v11 = vmax.f32 %v1470_v1, 0.0  ;;  %v1541_v16 = vmax.f32 %v3524_v54, 0.0  ;;  %v1596_v20 = vld [vmem:[#allocation16 + $0x18] sm:$0xff]  ;;  %v1495_v29 = vld [vmem:[#allocation4 + $0x48] sm:$0xff] }
 0x1bd   : > { %1619 = vmatpush.msra.mxu0 %v1602_v22  ;;  %2409 = vmatpush.msra.mxu1 %v1602_v22  ;;  %v1398_v49 = vld [vmem:[#allocation2 + $0x20] sm:$0xff]  ;;  %v1426_v60 = vmax.f32 %v1410_v44, 0.0  ;;  %v3528_v63 = vadd.f32 %v3510_v13, %v1494_v48  ;;  %v3537_v15 = vadd.f32 %v1553_v57, %v1537_v53  ;;  %v3542_v23 = vadd.f32 %v3499_v8, %v1391_v3  ;;  %v1451_v25 = vld [vmem:[#allocation3 + $0x18] sm:$0xff]  ;;  %v1402_v31 = vld [vmem:[#allocation2 + $0x70] sm:$0xff] }
 0x1be   : > { %2410 = vmatpush.msra.mxu2 %v1602_v22  ;;  %2411 = vmatpush.msra.mxu3 %v1602_v22  ;;  %v1418_v0 = vadd.f32 %v3499_v8, %v1398_v49  ;;  %v1597_v5 = vld [vmem:[#allocation16 + $0x20] sm:$0xff]  ;;  %v1557_v17 = vadd.f32 %v1489_v59, %v1437_v58  ;;  %v1414_v24 = vadd.f32 %v3499_v8, %v1394_v4  ;;  %v1538_v26 = vmax.f32 %v1522_v2, 0.0  ;;  %v1595_v32 = vld [vmem:[#allocation16 + $0x10] sm:$0xff]  ;;  %v1454_v37 = vld [vmem:[#allocation3 + $0x8] sm:$0xff] }
 0x1bf   : > { %1620 = vmatpush.msra.mxu0 %v1601_v33  ;;  %2412 = vmatpush.msra.mxu1 %v1601_v33  ;;  %v1530_v21 = vmax.f32 %v3528_v63, 0.0  ;;  %v1546_v22 = vadd.f32 %v1478_v62, %v1426_v60  ;;  %v1463_v28 = vadd.f32 %v3504_v10, %v1443_v12  ;;  %v1466_v30 = vadd.f32 %v3504_v10, %v1446_v14  ;;  %v1594_v43 = vld [vmem:[#allocation16 + $0x8] sm:$0xff]  ;;  %v1503_v47 = vld [vmem:[#allocation4 + $0x70] sm:$0xff]  ;;  %v1593_v53 = vld [vmem:[#allocation16] sm:$0xff] }
 0x1c0   : > { %2413 = vmatpush.msra.mxu2 %v1601_v33  ;;  %2414 = vmatpush.msra.mxu3 %v1601_v33  ;;  %v1434_v9 = vmax.f32 %v1418_v0, 0.0  ;;  %v1577_v33 = vmax.f32 %v3533_v6, 0.0  ;;  %v1581_v34 = vmax.f32 %v3535_v7, 0.0  ;;  %v1518_v35 = vadd.f32 %v3510_v13, %v1498_v18  ;;  %v1403_v58 = vld [vmem:[#allocation2 + $0x78] sm:$0xff]  ;;  %v1455_v63 = vld [vmem:[#allocation3 + $0x60] sm:$0xff]  ;;  %v1507_v7 = vld [vmem:[#allocation4 + $0x50] sm:$0xff] }
 0x1c1   : > { %1621 = vmatpush.msra.mxu0 %v1600_v42  ;;  %2415 = vmatpush.msra.mxu1 %v1600_v42  ;;  %v3551_v36 = vadd.f32 %v3499_v8, %v1399_v19  ;;  %v1585_v38 = vmax.f32 %v3537_v15, 0.0  ;;  %v1430_v39 = vmax.f32 %v1414_v24, 0.0  ;;  %v1482_v40 = vmax.f32 %v1466_v30, 0.0  ;;  %v1392_v14 = vld [vmem:[#allocation2 + $0x18] sm:$0xff]  ;;  %v1395_v15 = vld [vmem:[#allocation2 + $0x8] sm:$0xff] }
 0x1c2   : > { %2416 = vmatpush.msra.mxu2 %v1600_v42  ;;  %2417 = vmatpush.msra.mxu3 %v1600_v42  ;;  %v1554_v27 = vadd.f32 %v1486_v11, %v1434_v9  ;;  %v1471_v41 = vadd.f32 %v3504_v10, %v1451_v25  ;;  %v1506_v42 = vld [vmem:[#allocation4 + $0x30] sm:$0xff]  ;;  %v1573_v44 = vadd.f32 %v1557_v17, %v1541_v16  ;;  %v1427_v45 = vmax.f32 %v3542_v23, 0.0  ;;  %v1452_v11 = vld [vmem:[#allocation3 + $0x58] sm:$0xff] }
 0x1c3   : > { %1622 = vmatpush.msra.mxu0 %v1599_v51  ;;  %2418 = vmatpush.msra.mxu1 %v1599_v51  ;;  %v1515_v46 = vadd.f32 %v3510_v13, %v1495_v29  ;;  %v1422_v48 = vadd.f32 %v3499_v8, %v1402_v31  ;;  %v3558_v49 = vadd.f32 %v1546_v22, %v1530_v21  ;;  %v1534_v54 = vmax.f32 %v1518_v35, 0.0  ;;  %v1444_v21 = vld [vmem:[#allocation3 + $0x40] sm:$0xff]  ;;  %v1447_v22 = vld [vmem:[#allocation3 + $0x70] sm:$0xff] }
 0x1c4   : > { %2419 = vmatpush.msra.mxu2 %v1599_v51  ;;  %2420 = vmatpush.msra.mxu3 %v1599_v51  ;;  %v3560_v50 = vadd.f32 %v1554_v27, %v1538_v26  ;;  %v1479_v51 = vmax.f32 %v1463_v28, 0.0  ;;  %v1474_v52 = vadd.f32 %v3504_v10, %v1454_v37  ;;  %v1435_v55 = vmax.f32 %v3551_v36, 0.0  ;;  %v1499_v27 = vld [vmem:[#allocation4 + $0x10] sm:$0xff]  ;;  %v1404_v36 = vld [vmem:[#allocation2 + $0x28] sm:$0xff] }
 0x1c5   : > { %1623 = vmatpush.msra.mxu0 %v1598_v61  ;;  %2421 = vmatpush.msra.mxu1 %v1598_v61  ;;  %v1438_v56 = vmax.f32 %v1422_v48, 0.0  ;;  %v1526_v57 = vadd.f32 %v3510_v13, %v1506_v42  ;;  %v1550_v59 = vadd.f32 %v1482_v40, %v1430_v39  ;;  %v1487_v60 = vmax.f32 %v1471_v41, 0.0  ;;  %v1456_v37 = vld [vmem:[#allocation3 + $0x50] sm:$0xff]  ;;  %v1496_v40 = vld [vmem:[#allocation4 + $0x60] sm:$0xff]  ;;  %v1448_v48 = vld [vmem:[#allocation3 + $0x38] sm:$0xff] }
 0x1c6   : > { %2422 = vmatpush.msra.mxu2 %v1598_v61  ;;  %2423 = vmatpush.msra.mxu3 %v1598_v61  ;;  %v1523_v61 = vadd.f32 %v3510_v13, %v1503_v47  ;;  %v1490_v62 = vmax.f32 %v1474_v52, 0.0  ;;  %v1589_v0 = vmax.f32 %v1573_v44, 0.0  ;;  %v1531_v2 = vmax.f32 %v1515_v46, 0.0 }
 0x1c7   : > { %1624 = vmatpush.msra.mxu0 %v1597_v5  ;;  %2424 = vmatpush.msra.mxu1 %v1597_v5  ;;  %v1542_v1 = vmax.f32 %v1526_v57, 0.0  ;;  %v1547_v3 = vadd.f32 %v1479_v51, %v1427_v45  ;;  %v1423_v6 = vadd.f32 %v3499_v8, %v1403_v58  ;;  %v1578_v9 = vmax.f32 %v3558_v49, 0.0  ;;  %v1500_v49 = vld [vmem:[#allocation4 + $0x38] sm:$0xff] }
 0x1c8   : > { %2425 = vmatpush.msra.mxu2 %v1597_v5  ;;  %2426 = vmatpush.msra.mxu3 %v1597_v5  ;;  %v1558_v4 = vadd.f32 %v1490_v62, %v1438_v56  ;;  %v1400_v5 = vld [vmem:[#allocation2 + $0x38] sm:$0xff]  ;;  %v1475_v12 = vadd.f32 %v3504_v10, %v1455_v63  ;;  %v1586_v16 = vmax.f32 %v3560_v50, 0.0  ;;  %v1566_v17 = vadd.f32 %v1550_v59, %v1534_v54 }
 0x1c9   : > { %1625 = vmatpush.msra.mxu0 %v1596_v20  ;;  %2427 = vmatpush.msra.mxu1 %v1596_v20  ;;  %v1539_v18 = vmax.f32 %v1523_v61, 0.0  ;;  %v1555_v19 = vadd.f32 %v1487_v60, %v1435_v55  ;;  %v1439_v24 = vmax.f32 %v1423_v6, 0.0  ;;  %v1527_v26 = vadd.f32 %v3510_v13, %v1507_v7  ;;  %v1508_v57 = vld [vmem:[#allocation4 + $0x78] sm:$0xff] }
 0x1ca   : > { %2428 = vmatpush.msra.mxu2 %v1596_v20  ;;  %2429 = vmatpush.msra.mxu3 %v1596_v20  ;;  %v1504_v20 = vld [vmem:[#allocation4 + $0x20] sm:$0xff]  ;;  %v1574_v23 = vadd.f32 %v1558_v4, %v1542_v1  ;;  %v1491_v25 = vmax.f32 %v1475_v12, 0.0  ;;  %v1563_v28 = vadd.f32 %v1547_v3, %v1531_v2  ;;  %v1420_v29 = vadd.f32 %v3499_v8, %v1400_v5 }
 0x1cb   : > { %1626 = vmatpush.msra.mxu0 %v1595_v32  ;;  %2430 = vmatpush.msra.mxu1 %v1595_v32  ;;  %v1412_v30 = vadd.f32 %v3499_v8, %v1392_v14  ;;  %v1415_v31 = vadd.f32 %v3499_v8, %v1395_v15  ;;  %v1467_v35 = vadd.f32 %v3504_v10, %v1447_v22  ;;  %v1543_v45 = vmax.f32 %v1527_v26, 0.0  ;;  %v2611_v26 = vld [vmem:[%s3854_s13] ss:$0 sm:$0xff] }
 0x1cc   : > { %2431 = vmatpush.msra.mxu2 %v1595_v32  ;;  %2432 = vmatpush.msra.mxu3 %v1595_v32  ;;  %v1472_v32 = vadd.f32 %v3504_v10, %v1452_v11  ;;  %v1571_v39 = vadd.f32 %v1555_v19, %v1539_v18  ;;  %v1519_v42 = vadd.f32 %v3510_v13, %v1499_v27  ;;  %v1590_v44 = vmax.f32 %v1574_v23, 0.0 }
 0x1cd   : > { %1627 = vmatpush.msra.mxu0 %v1594_v43  ;;  %2433 = vmatpush.msra.mxu1 %v1594_v43  ;;  %v1431_v41 = vmax.f32 %v1415_v31, 0.0  ;;  %v1559_v46 = vadd.f32 %v1491_v25, %v1439_v24  ;;  %v1483_v47 = vmax.f32 %v1467_v35, 0.0  ;;  %v1428_v50 = vmax.f32 %v1412_v30, 0.0 }
 0x1ce   : > { %2434 = vmatpush.msra.mxu2 %v1594_v43  ;;  %2435 = vmatpush.msra.mxu3 %v1594_v43  ;;  %v1396_v43 = vld [vmem:[#allocation2 + $0x48] sm:$0xff]  ;;  %v1535_v51 = vmax.f32 %v1519_v42, 0.0  ;;  %v1424_v52 = vadd.f32 %v3499_v8, %v1404_v36  ;;  %v1516_v55 = vadd.f32 %v3510_v13, %v1496_v40  ;;  %v1436_v59 = vmax.f32 %v1420_v29, 0.0 }
 0x1cf   : > { %1628 = vmatpush.msra.mxu0 %v1593_v53  ;;  %2436 = vmatpush.msra.mxu1 %v1593_v53  ;;  %v1551_v56 = vadd.f32 %v1483_v47, %v1431_v41  ;;  %v1416_v58 = vadd.f32 %v3499_v8, %v1396_v43  ;;  %v1488_v60 = vmax.f32 %v1472_v32, 0.0  ;;  %v1468_v61 = vadd.f32 %v3504_v10, %v1448_v48 }
 0x1d0   : > { %2437 = vmatpush.msra.mxu2 %v1593_v53  ;;  %1629 = vmatmul.f32.vlgmr.msra.gmra.mxu0 %v1577_v33  ;;  %v1524_v33 = vadd.f32 %v3510_v13, %v1504_v20  ;;  %v1520_v62 = vadd.f32 %v3510_v13, %v1500_v49  ;;  %v1579_v63 = vmax.f32 %v1563_v28, 0.0  ;;  %v1440_v3 = vmax.f32 %v1424_v52, 0.0 }
 0x1d1   : > { %1641 = vmatmul.f32.vlgmr.msra.gmra.mxu1 %v1581_v34  ;;  %1653 = vmatmul.f32.vlgmr.msra.gmra.mxu2 %v1585_v38  ;;  %v1464_v34 = vadd.f32 %v3504_v10, %v1444_v21  ;;  %v1582_v38 = vmax.f32 %v1566_v17, 0.0  ;;  %v1567_v1 = vadd.f32 %v1551_v56, %v1535_v51  ;;  %v1432_v2 = vmax.f32 %v1416_v58, 0.0 }
 0x1d2   : > { %2438 = vmatpush.msra.mxu3 %v1593_v53  ;;  %v1476_v53 = vadd.f32 %v3504_v10, %v1456_v37  ;;  %v1528_v5 = vadd.f32 %v3510_v13, %v1508_v57  ;;  %v1484_v6 = vmax.f32 %v1468_v61, 0.0  ;;  %v1587_v7 = vmax.f32 %v1571_v39, 0.0 }
 0x1d3   : > { %1665 = vmatmul.f32.vlgmr.msra.gmra.mxu3 %v1589_v0  ;;  %v1480_v54 = vmax.f32 %v1464_v34, 0.0  ;;  %v1575_v0 = vadd.f32 %v1559_v46, %v1543_v45  ;;  %v1540_v8 = vmax.f32 %v1524_v33, 0.0  ;;  %v1556_v12 = vadd.f32 %v1488_v60, %v1436_v59 }
 0x1d4   : > { %v1492_v4 = vmax.f32 %v1476_v53, 0.0  ;;  %v1583_v14 = vmax.f32 %v1567_v1, 0.0  ;;  %v1536_v15 = vmax.f32 %v1520_v62, 0.0  ;;  %v1552_v10 = vadd.f32 %v1484_v6, %v1432_v2 }
 0x1d5   : > { %v1548_v11 = vadd.f32 %v1480_v54, %v1428_v50  ;;  %v1544_v17 = vmax.f32 %v1528_v5, 0.0  ;;  %v1572_v20 = vadd.f32 %v1556_v12, %v1540_v8 }
 0x1d6   : > { %v1560_v18 = vadd.f32 %v1492_v4, %v1440_v3  ;;  %v1568_v21 = vadd.f32 %v1552_v10, %v1536_v15 }
 0x1d7   : > { %v1588_v23 = vmax.f32 %v1572_v20, 0.0 }
 0x1d8   : > { %1632 = vmatmul.f32.gmra.mxu0 %v1578_v9  ;;  %v1532_v9 = vmax.f32 %v1516_v55, 0.0  ;;  %v1576_v13 = vadd.f32 %v1560_v18, %v1544_v17  ;;  %v1584_v24 = vmax.f32 %v1568_v21, 0.0 }
 0x1d9   : > { %1656 = vmatmul.f32.gmra.mxu2 %v1586_v16  ;;  %1644 = vmatmul.f32.gmra.mxu1 %v1582_v38  ;;  %v1591_v16 = vmax.f32 %v1575_v0, 0.0 }
 0x1da   : > { %v1564_v19 = vadd.f32 %v1548_v11, %v1532_v9  ;;  %v1592_v25 = vmax.f32 %v1576_v13, 0.0 }
 0x1db   : > { %1668 = vmatmul.f32.gmra.mxu3 %v1590_v44 }
 0x1dc   : > { %v1580_v22 = vmax.f32 %v1564_v19, 0.0 }
 0x1e0   : > { %1635 = vmatmul.f32.gmra.mxu0 %v1579_v63 }
 0x1e1   : > { %1659 = vmatmul.f32.gmra.mxu2 %v1587_v7  ;;  %1647 = vmatmul.f32.gmra.mxu1 %v1583_v14 }
 0x1e3   : > { %1671 = vmatmul.f32.gmra.mxu3 %v1591_v16 }
 0x1e8   : > { %1638 = vmatmul.f32.gmra.mxu0 %v1580_v22 }
 0x1e9   : > { %1662 = vmatmul.f32.gmra.mxu2 %v1588_v23  ;;  %1650 = vmatmul.f32.gmra.mxu1 %v1584_v24 }
 0x1eb   : > { %1674 = vmatmul.f32.gmra.mxu3 %v1592_v25 }
 0x24d   : > { %v1630_v27 = vpop.f32.mrf.mxu0 }
 0x24e   : > { %v1631_v28 = vadd.f32 %v2611_v26, %v1630_v27  ;;  %v1642_v29 = vpop.f32.mrf.mxu1 }
 0x24f   : > { %v1643_v30 = vadd.f32 %v2611_v26, %v1642_v29 }
 0x250   : > { %1678 = vmax.xlane.f32.xlu0 %v1631_v28 }
 0x251   : > { %1686 = vmax.xlane.f32.xlu2 %v1643_v30 }
 0x254   : > { %v1654_v31 = vpop.f32.mrf.mxu2 }
 0x255   : > { %v1655_v32 = vadd.f32 %v2611_v26, %v1654_v31  ;;  %v1633_v33 = vpop.f32.mrf.mxu0 }
 0x256   : > { %v1666_v34 = vpop.f32.mrf.mxu3  ;;  %v1645_v36 = vpop.f32.mrf.mxu1  ;;  %v1634_v42 = vadd.f32 %v2611_v26, %v1633_v33 }
 0x257   : > { %v1667_v35 = vadd.f32 %v2611_v26, %v1666_v34  ;;  %v1646_v39 = vadd.f32 %v2611_v26, %v1645_v36 }
 0x259   : > { %1694 = vmax.xlane.f32.xlu2 %v1655_v32  ;;  %1702 = vmax.xlane.f32.xlu0 %v1667_v35 }
 0x25c   : > { %v1657_v37 = vpop.f32.mrf.mxu2 }
 0x25d   : > { %v1636_v38 = vpop.f32.mrf.mxu0  ;;  %v1658_v45 = vadd.f32 %v2611_v26, %v1657_v37 }
 0x25e   : > { %v1637_v40 = vadd.f32 %v2611_v26, %v1636_v38  ;;  %v1669_v41 = vpop.f32.mrf.mxu3  ;;  %v1648_v46 = vpop.f32.mrf.mxu1 }
 0x25f   : > { %v3593_v52 = vadd.f32 %v2611_v26, %v1648_v46  ;;  %v3607_v58 = vadd.f32 %v2611_v26, %v1669_v41 }
 0x260   : > { %1682 = vmax.xlane.f32.xlu1 %v1637_v40 }
 0x261   : > { %1688 = vmax.xlane.f32.xlu2 %v1646_v39  ;;  %1680 = vmax.xlane.f32.xlu0 %v1634_v42 }
 0x264   : > { %v1660_v43 = vpop.f32.mrf.mxu2 }
 0x265   : > { %v1661_v44 = vadd.f32 %v2611_v26, %v1660_v43  ;;  %v1639_v48 = vpop.f32.mrf.mxu0 }
 0x266   : > { %v1672_v47 = vpop.f32.mrf.mxu3  ;;  %v3589_v50 = vadd.f32 %v2611_v26, %v1639_v48  ;;  %v1651_v53 = vpop.f32.mrf.mxu1 }
 0x267   : > { %v3598_v55 = vadd.f32 %v2611_v26, %v1672_v47  ;;  %v3600_v56 = vadd.f32 %v2611_v26, %v1651_v53 }
 0x268   : > { %1698 = vmax.xlane.f32.xlu1 %v1661_v44 }
 0x269   : > { %1696 = vmax.xlane.f32.xlu0 %v1658_v45 }
 0x26c   : > { %v1663_v49 = vpop.f32.mrf.mxu2 }
 0x26d   : > { %v3591_v51 = vadd.f32 %v2611_v26, %v1663_v49 }
 0x26e   : > { %v1675_v54 = vpop.f32.mrf.mxu3 }
 0x26f   : > { %1700 = vmax.xlane.f32.xlu2 %v3591_v51  ;;  %v3602_v57 = vadd.f32 %v2611_v26, %v1675_v54 }
 0x270   : > { %1684 = vmax.xlane.f32.xlu1 %v3589_v50 }
 0x271   : > { %1690 = vmax.xlane.f32.xlu0 %v3593_v52 }
 0x277   : > { %1706 = vmax.xlane.f32.xlu2 %v3598_v55 }
 0x278   : > { %1692 = vmax.xlane.f32.xlu1 %v3600_v56 }
 0x279   : > { %1708 = vmax.xlane.f32.xlu0 %v3602_v57 }
 0x280   : > { %1704 = vmax.xlane.f32.xlu1 %v3607_v58 }
 0x2c3   : > { %v1679_v59 = vpop.xlane.xlu0 %1678 }
 0x2c4   : > { %v1687_v60 = vpop.xlane.xlu2 %1686  ;;  %v3610_v61 = vsub.f32 %v1631_v28, %v1679_v59 }
 0x2c5   : > { %v3612_v62 = vsub.f32 %v1643_v30, %v1687_v60 }
 0x2c6   : > { %v1726_v63 = vmul.f32 1.442695, %v3610_v61 }
 0x2c7   : > { %v1734_v0 = vmul.f32 1.442695, %v3612_v62 }
 0x2c8   : > { %2612 = vpow2.f32 %v1726_v63 }
 0x2c9   : > { %2614 = vpow2.f32 %v1734_v0 }
 0x2cc   : > { %v1695_v1 = vpop.xlane.xlu2 %1694  ;;  %v1703_v2 = vpop.xlane.xlu0 %1702 }
 0x2cd   : > { %v3616_v3 = vsub.f32 %v1655_v32, %v1695_v1  ;;  %v3618_v4 = vsub.f32 %v1667_v35, %v1703_v2 }
 0x2ce   : > { %v2613_v5 = vpop.eup %2612 }
 0x2cf   : > { %v2615_v6 = vpop.eup %2614  ;;  %v1742_v7 = vmul.f32 1.442695, %v3616_v3  ;;  %v1750_v8 = vmul.f32 1.442695, %v3618_v4  ;;  %1758 = vadd.xlane.f32.xlu1 %v2613_v5 }
 0x2d0   : > { %1766 = vadd.xlane.f32.xlu2 %v2615_v6 }
 0x2d1   : > { %2616 = vpow2.f32 %v1742_v7 }
 0x2d2   : > { %2618 = vpow2.f32 %v1750_v8 }
 0x2d3   : > { %v1683_v9 = vpop.xlane.xlu1 %1682 }
 0x2d4   : > { %v1689_v11 = vpop.xlane.xlu2 %1688  ;;  %v1681_v12 = vpop.xlane.xlu0 %1680  ;;  %v3627_v17 = vsub.f32 %v1637_v40, %v1683_v9 }
 0x2d5   : > { %v3622_v14 = vsub.f32 %v1646_v39, %v1689_v11  ;;  %v3624_v15 = vsub.f32 %v1634_v42, %v1681_v12 }
 0x2d6   : > { %v1730_v20 = vmul.f32 1.442695, %v3627_v17 }
 0x2d7   : > { %v2617_v10 = vpop.eup %2616  ;;  %v1736_v16 = vmul.f32 1.442695, %v3622_v14  ;;  %v1728_v18 = vmul.f32 1.442695, %v3624_v15 }
 0x2d8   : > { %v2619_v19 = vpop.eup %2618  ;;  %1774 = vadd.xlane.f32.xlu0 %v2617_v10 }
 0x2d9   : > { %2620 = vpow2.f32 %v1736_v16  ;;  %1782 = vadd.xlane.f32.xlu1 %v2619_v19 }
 0x2da   : > { %2622 = vpow2.f32 %v1728_v18 }
 0x2db   : > { %v1699_v21 = vpop.xlane.xlu1 %1698  ;;  %2624 = vpow2.f32 %v1730_v20 }
 0x2dc   : > { %v3631_v13 = vsub.f32 %v1661_v44, %v1699_v21  ;;  %v1697_v22 = vpop.xlane.xlu0 %1696 }
 0x2dd   : > { %v3633_v23 = vsub.f32 %v1658_v45, %v1697_v22 }
 0x2de   : > { %v1746_v24 = vmul.f32 1.442695, %v3631_v13 }
 0x2df   : > { %v2621_v25 = vpop.eup %2620  ;;  %v1744_v26 = vmul.f32 1.442695, %v3633_v23 }
 0x2e0   : > { %v2623_v27 = vpop.eup %2622  ;;  %2626 = vpow2.f32 %v1746_v24  ;;  %1768 = vadd.xlane.f32.xlu0 %v2621_v25 }
 0x2e1   : > { %2628 = vpow2.f32 %v1744_v26  ;;  %1760 = vadd.xlane.f32.xlu2 %v2623_v27  ;;  %v2625_v32 = vpop.eup %2624 }
 0x2e2   : > { %v1701_v28 = vpop.xlane.xlu2 %1700 }
 0x2e3   : > { %v3638_v29 = vsub.f32 %v3591_v51, %v1701_v28  ;;  %v1685_v30 = vpop.xlane.xlu1 %1684 }
 0x2e4   : > { %v1691_v31 = vpop.xlane.xlu0 %1690  ;;  %v3645_v37 = vsub.f32 %v3589_v50, %v1685_v30 }
 0x2e5   : > { %v1748_v33 = vmul.f32 1.442695, %v3638_v29  ;;  %v3642_v34 = vsub.f32 %v3593_v52, %v1691_v31 }
 0x2e6   : > { %v2627_v35 = vpop.eup %2626  ;;  %v1732_v40 = vmul.f32 1.442695, %v3645_v37 }
 0x2e7   : > { %v2629_v36 = vpop.eup %2628  ;;  %v1738_v38 = vmul.f32 1.442695, %v3642_v34  ;;  %2630 = vpow2.f32 %v1748_v33 }
 0x2e8   : > { %1762 = vadd.xlane.f32.xlu0 %v2625_v32  ;;  %1776 = vadd.xlane.f32.xlu1 %v2629_v36 }
 0x2e9   : > { %2632 = vpow2.f32 %v1738_v38  ;;  %1778 = vadd.xlane.f32.xlu2 %v2627_v35 }
 0x2ea   : > { %v1707_v39 = vpop.xlane.xlu2 %1706  ;;  %2634 = vpow2.f32 %v1732_v40 }
 0x2eb   : > { %v3650_v41 = vsub.f32 %v3598_v55, %v1707_v39  ;;  %v1693_v42 = vpop.xlane.xlu1 %1692 }
 0x2ec   : > { %v3653_v43 = vsub.f32 %v3600_v56, %v1693_v42  ;;  %v1709_v47 = vpop.xlane.xlu0 %1708 }
 0x2ed   : > { %v1754_v44 = vmul.f32 1.442695, %v3650_v41  ;;  %v2631_v45 = vpop.eup %2630  ;;  %v3658_v49 = vsub.f32 %v3602_v57, %v1709_v47 }
 0x2ee   : > { %v1740_v46 = vmul.f32 1.442695, %v3653_v43 }
 0x2ef   : > { %v2633_v48 = vpop.eup %2632  ;;  %v1756_v53 = vmul.f32 1.442695, %v3658_v49 }
 0x2f0   : > { %2636 = vpow2.f32 %v1740_v46  ;;  %1780 = vadd.xlane.f32.xlu0 %v2631_v45  ;;  %1770 = vadd.xlane.f32.xlu1 %v2633_v48  ;;  %v2635_v52 = vpop.eup %2634 }
 0x2f1   : > { %2638 = vpow2.f32 %v1754_v44 }
 0x2f3   : > { %v1705_v50 = vpop.xlane.xlu1 %1704 }
 0x2f4   : > { %v3661_v51 = vsub.f32 %v3607_v58, %v1705_v50 }
 0x2f6   : > { %v2637_v54 = vpop.eup %2636  ;;  %v1752_v55 = vmul.f32 1.442695, %v3661_v51 }
 0x2f7   : > { %v2639_v56 = vpop.eup %2638  ;;  %1772 = vadd.xlane.f32.xlu2 %v2637_v54 }
 0x2f8   : > { %2640 = vpow2.f32 %v1752_v55  ;;  %1786 = vadd.xlane.f32.xlu0 %v2639_v56  ;;  %1764 = vadd.xlane.f32.xlu1 %v2635_v52 }
 0x2f9   : > { %2642 = vpow2.f32 %v1756_v53 }
 0x2fe   : > { %v2641_v59 = vpop.eup %2640 }
 0x2ff   : > { %v2643_v60 = vpop.eup %2642  ;;  %1784 = vadd.xlane.f32.xlu2 %v2641_v59 }
 0x300   : > { %1788 = vadd.xlane.f32.xlu1 %v2643_v60 }
 0x342   : > { %v1759_v57 = vpop.xlane.xlu1 %1758 }
 0x343   : > { %v1767_v58 = vpop.xlane.xlu2 %1766  ;;  %2644 = vlog2.f32 %v1759_v57 }
 0x344   : > { %2646 = vlog2.f32 %v1767_v58 }
 0x349   : > { %v2645_v63 = vpop.eup %2644 }
 0x34a   : > { %v2647_v0 = vpop.eup %2646  ;;  %v1791_v1 = vmul.f32 0.6931472, %v2645_v63 }
 0x34b   : > { %v1799_v2 = vmul.f32 0.6931472, %v2647_v0  ;;  %v1775_v5 = vpop.xlane.xlu0 %1774 }
 0x34c   : > { %v1822_v6 = vsub.f32 %v3610_v61, %v1791_v1  ;;  %v1783_v7 = vpop.xlane.xlu1 %1782  ;;  %2648 = vlog2.f32 %v1775_v5 }
 0x34d   : > { %v1826_v8 = vsub.f32 %v3612_v62, %v1799_v2  ;;  %2650 = vlog2.f32 %v1783_v7 }
 0x34e   : > { %1838 = vst [vmem:[%s3420_s8] sm:$0xff] %v1822_v6 }
 0x34f   : > { %1842 = vst [vmem:[%s3420_s8 + $0x20] sm:$0xff] %v1826_v8 }
 0x352   : > { %v2649_v9 = vpop.eup %2648 }
 0x353   : > { %v2651_v11 = vpop.eup %2650  ;;  %v1807_v12 = vmul.f32 0.6931472, %v2649_v9  ;;  %v1769_v10 = vpop.xlane.xlu0 %1768 }
 0x354   : > { %v1815_v16 = vmul.f32 0.6931472, %v2651_v11  ;;  %v1761_v18 = vpop.xlane.xlu2 %1760  ;;  %2652 = vlog2.f32 %v1769_v10 }
 0x355   : > { %v1830_v19 = vsub.f32 %v3616_v3, %v1807_v12  ;;  %2654 = vlog2.f32 %v1761_v18 }
 0x356   : > { %v1834_v61 = vsub.f32 %v3618_v4, %v1815_v16 }
 0x357   : > { %1846 = vst [vmem:[%s3420_s8 + $0x40] sm:$0xff] %v1830_v19 }
 0x358   : > { %1850 = vst [vmem:[%s3420_s8 + $0x60] sm:$0xff] %v1834_v61 }
 0x35a   : > { %v2653_v62 = vpop.eup %2652 }
 0x35b   : > { %v2655_v20 = vpop.eup %2654  ;;  %v1801_v21 = vmul.f32 0.6931472, %v2653_v62  ;;  %v1777_v22 = vpop.xlane.xlu1 %1776 }
 0x35c   : > { %v1763_v24 = vpop.xlane.xlu0 %1762  ;;  %v1793_v25 = vmul.f32 0.6931472, %v2655_v20  ;;  %v1779_v26 = vpop.xlane.xlu2 %1778  ;;  %2656 = vlog2.f32 %v1777_v22 }
 0x35d   : > { %v1827_v27 = vsub.f32 %v3622_v14, %v1801_v21  ;;  %2658 = vlog2.f32 %v1779_v26 }
 0x35e   : > { %v1823_v3 = vsub.f32 %v3624_v15, %v1793_v25  ;;  %2660 = vlog2.f32 %v1763_v24 }
 0x35f   : > { %1843 = vst [vmem:[%s3420_s8 + $0x28] sm:$0xff] %v1827_v27 }
 0x360   : > { %1839 = vst [vmem:[%s3420_s8 + $0x8] sm:$0xff] %v1823_v3 }
 0x362   : > { %v2657_v4 = vpop.eup %2656 }
 0x363   : > { %v2659_v28 = vpop.eup %2658  ;;  %v1809_v30 = vmul.f32 0.6931472, %v2657_v4  ;;  %v1771_v31 = vpop.xlane.xlu1 %1770 }
 0x364   : > { %v1781_v32 = vpop.xlane.xlu0 %1780  ;;  %v2661_v33 = vpop.eup %2660  ;;  %v1811_v35 = vmul.f32 0.6931472, %v2659_v28  ;;  %2662 = vlog2.f32 %v1771_v31 }
 0x365   : > { %v1831_v36 = vsub.f32 %v3633_v23, %v1809_v30  ;;  %v1795_v14 = vmul.f32 0.6931472, %v2661_v33  ;;  %2664 = vlog2.f32 %v1781_v32 }
 0x366   : > { %v1832_v15 = vsub.f32 %v3631_v13, %v1811_v35 }
 0x367   : > { %1847 = vst [vmem:[%s3420_s8 + $0x48] sm:$0xff] %v1831_v36  ;;  %v1824_v38 = vsub.f32 %v3627_v17, %v1795_v14 }
 0x368   : > { %1848 = vst [vmem:[%s3420_s8 + $0x50] sm:$0xff] %v1832_v15 }
 0x369   : > { %1840 = vst [vmem:[%s3420_s8 + $0x10] sm:$0xff] %v1824_v38 }
 0x36a   : > { %v2663_v39 = vpop.eup %2662  ;;  %v1773_v40 = vpop.xlane.xlu2 %1772 }
 0x36b   : > { %v2665_v42 = vpop.eup %2664  ;;  %v1803_v44 = vmul.f32 0.6931472, %v2663_v39  ;;  %2666 = vlog2.f32 %v1773_v40  ;;  %v1765_v45 = vpop.xlane.xlu1 %1764 }
 0x36c   : > { %v1787_v46 = vpop.xlane.xlu0 %1786  ;;  %v1813_v47 = vmul.f32 0.6931472, %v2665_v42  ;;  %2668 = vlog2.f32 %v1765_v45 }
 0x36d   : > { %v1828_v23 = vsub.f32 %v3642_v34, %v1803_v44  ;;  %2670 = vlog2.f32 %v1787_v46 }
 0x36e   : > { %v1833_v13 = vsub.f32 %v3638_v29, %v1813_v47 }
 0x36f   : > { %1844 = vst [vmem:[%s3420_s8 + $0x30] sm:$0xff] %v1828_v23 }
 0x370   : > { %1849 = vst [vmem:[%s3420_s8 + $0x58] sm:$0xff] %v1833_v13 }
 0x371   : > { %v2667_v17 = vpop.eup %2666 }
 0x372   : > { %v2669_v48 = vpop.eup %2668  ;;  %v1805_v50 = vmul.f32 0.6931472, %v2667_v17  ;;  %v1785_v52 = vpop.xlane.xlu2 %1784 }
 0x373   : > { %v2671_v53 = vpop.eup %2670  ;;  %v1797_v54 = vmul.f32 0.6931472, %v2669_v48  ;;  %2672 = vlog2.f32 %v1785_v52  ;;  %v1789_v55 = vpop.xlane.xlu1 %1788 }
 0x374   : > { %v1829_v34 = vsub.f32 %v3653_v43, %v1805_v50  ;;  %v1819_v56 = vmul.f32 0.6931472, %v2671_v53  ;;  %2674 = vlog2.f32 %v1789_v55 }
 0x375   : > { %v1825_v29 = vsub.f32 %v3645_v37, %v1797_v54 }
 0x376   : > { %1845 = vst [vmem:[%s3420_s8 + $0x38] sm:$0xff] %v1829_v34  ;;  %v1836_v59 = vsub.f32 %v3650_v41, %v1819_v56 }
 0x377   : > { %1841 = vst [vmem:[%s3420_s8 + $0x18] sm:$0xff] %v1825_v29 }
 0x378   : > { %1852 = vst [vmem:[%s3420_s8 + $0x70] sm:$0xff] %v1836_v59 }
 0x379   : > { %v2673_v60 = vpop.eup %2672 }
 0x37a   : > { %v2675_v57 = vpop.eup %2674  ;;  %v1817_v58 = vmul.f32 0.6931472, %v2673_v60 }
 0x37b   : > { %v1821_v63 = vmul.f32 0.6931472, %v2675_v57 }
 0x37c   : > { %v1835_v0 = vsub.f32 %v3661_v51, %v1817_v58 }
 0x37d   : > { %v1837_v1 = vsub.f32 %v3658_v49, %v1821_v63 }
 0x37e   : > { %1851 = vst [vmem:[%s3420_s8 + $0x68] sm:$0xff] %v1835_v0 }
 0x37f   : > { %1853 = vst [vmem:[%s3420_s8 + $0x78] sm:$0xff] %v1837_v1 }
 0x380 PF: > { %s3855_s7 = sld [smem:[#allocation29_spill]]  ;;  %s1867_s26 = sshll.u32 %s3420_s8, 4  ;;  %s1868_s26 = int_to_ptr.vmem [resolvable:$true] %s1867_s26 }
 0x381   : > { %s3858_s28 = sld [smem:[#allocation49_spill]]  ;;  %s1855_s17 = scalar_lea.sflag [#allocation7], %s648_s9 }
 0x386   : > { %s2366_s14 = sshll.u32 %s3855_s7, 7 }
 0x387   : > { %s3859_s0 = smov %s3858_s28  ;;  %s1866_s30 = scalar_lea.hbm %s3858_s28, %s2366_s14 }
 0x388   : > { %s1869_s12 = sshll.u32 %s1866_s30, 4  ;;  %s2906_s19 = scalar_lea.hbm %s3859_s0, 256  ;;  %s1870_s12 = int_to_ptr.hbm [resolvable:$true] %s1869_s12 }
 0x389   : > { %s2900_s23 = sshra.s32 %s1870_s12, 4  ;;  %s2901_s23 = int_to_ptr.hbm [resolvable:$true] %s2900_s23 }
 0x38a   : > { %s2902_s29 = scalar_lea.hbm %s2901_s23, 128  ;;  %p2907_p13 = scmp.lt.s32.totalorder %s2901_s23, %s3859_s0 }
 0x38b   : > { %p2903_p11 = scmp.ne.s32.totalorder %s2901_s23, %s2902_s29  ;;  %p2908_p0 = scmp.lt.s32.totalorder %s2906_s19, %s2902_s29 }
 0x38d   : > { %p2904_p6 = pnand %p2903_p11, %p3204_p7  ;;  %p2909_p2 = por %p2908_p0, %p2907_p13 }
 0x38f   : > { %p2905_p10 = pneg %p2904_p6 }
 0x391   : > { %p2910_p5 = pnand %p2909_p2, %p2905_p10 }
 0x393   : > { %2913 = shalt.err (!%p2910_p5)
}
 0x394   : > { %s3056_s9 = smov 128   ;;  %s3057_s8 = smov 8  }
 0x395   : > { %2455 = dma.vmem_to_hbm [thread:$0]  (%p3204_p7), %s1868_s26, 2048, %s1870_s12, %s1855_s17, %s3056_s9, %s3056_s9, %s3057_s8  }
 0x396 PF: > { %s3860_s1 = sld [smem:[#allocation32_spill]] }
 0x397   : > { %s3861_s6 = sld [smem:[#allocation24_spill]] }
 0x39c   : > { %p2487_p8 = scmp.ge.s32.totalorder %s3860_s1, 2 }
 0x39d   : > { %s1884_s13 = sand.u32 1, %s3861_s6  }
 0x39e   : > { %p2481_p12 = pnand %p2487_p8, %p3209_p9  ;;  %s1885_s7 = scalar_lea.sflag [#allocation7], %s1884_s13 }
 0x3a0   : > { %p2482_p4 = pneg %p2481_p12 }
 0x3a2   : > { %2991 = dma.done.wait (%p2482_p4), %s1885_s7, 2048  }
 0x3a3   : > { %2993 = vsyncadd (%p2482_p4), %s1885_s7, 4294965248  ;;  %s36_s30 = sadd.s32 1, %s3860_s1   ;;  %s3864_s17 = sld [smem:[#allocation25_spill]] }
 0x3a4   : > { %p3719_p3 = scmp.ge.s32.totalorder %s36_s30, 6   ;;  %s3865_s18 = sld [smem:[#allocation26_spill]] }
 0x3a5   : > { %s3866_s19 = sld [smem:[#allocation38_spill]]  ;;  %s3875_s20 = smov %s3012_s21 }
 0x3a6   : > { %s3867_s22 = sld [smem:[#allocation27_spill]]  ;;  %s3878_s23 = smov %s3024_s24 }
 0x3a7   : > { %s3868_s14 = sld [smem:[#allocation40_spill]]  ;;  %s3879_s24 = smov %s3028_s25 }
 0x3a8   : > { %s3869_s15 = sld [smem:[#allocation39_spill]] }
 0x3a9   : > { %s3870_s26 = sld [smem:[#allocation30_spill]] }
 0x3aa   : > { %s3871_s28 = sld [smem:[#allocation31_spill]] }
 0x3ab   : > { %s3872_s12 = sld [smem:[#allocation36_spill]] }
 0x3ac   : > { %s3873_s29 = sld [smem:[#allocation37_spill]]  ;;  %s3876_s21 = smov %s3867_s22 }
 0x3ad   : > { %s3877_s22 = smov %s3868_s14  ;;  %35 = sbr.rel (!%p3719_p3) target bundleno = 26 (0x1a), region = 182 }
 0x3ae   : > { %s3880_s25 = smov %s3869_s15 }
 0x3b0   : > { %s3881_s27 = smov %s3871_s28 }
 0x3b1   : > { %s3882_s28 = smov %s3872_s12 }
 0x3b2   :  { %1891 = vsyncpa [#allocation6], 1 }
 0x3b3   :  { %1893 = vsyncpa [#allocation6 + $0x1], 1 }
 0x3b4   :  { %1894 = vsyncpa [#allocation9], 1 }
 0x3b5   :  { %1896 = vsyncpa [#allocation9 + $0x1], 1 }
 0x3b6   :  { %1897 = vsyncpa [#allocation12], 1 }
 0x3b7   :  { %1899 = vsyncpa [#allocation12 + $0x1], 1 }
 0x3b8   :  { %1900 = vsyncpa [#allocation15], 1 }
 0x3b9   :  { %1902 = vsyncpa [#allocation15 + $0x1], 1 }
 0x3ba   :  { %1903 = vsyncpa [#allocation7], 1 }
 0x3bb   :  { %1905 = vsyncpa [#allocation7 + $0x1], 1 }

</bundles_post_ra>
